<compile_context>
chip_gen: v6e
topology: v6e:2x2x1
jax: 0.10.0
libtpu: 0.0.40
codegen_flags: <defaults>
</compile_context>

<pallas_src>
import functools

import jax
import jax.numpy as jnp
from jax import lax
from jax.experimental import pallas as pl
from jax.experimental.pallas import tpu as pltpu

EPS = 1e-5


def _res_multi_conv_kernel(x_ref, wf_ref, scale_ref, offs_ref, mask_ref,
                           out_ref, *, B, C, H, W):
    # Block shapes:
    #   x_ref    : (B, C, HW)  f32   B images, channel-major, flat spatial
    #   wf_ref   : (5, 2C, 5C) bf16  fused weight, chunked by kernel row dh
    #   scale_ref: (2C, 1)     f32   gamma * rsqrt(var + eps)
    #   offs_ref : (2C, 1)     f32   (bias - mean) * scale + beta
    #   mask_ref : (25, B*HW)  f32   per-tap validity (H and W boundaries)
    #   out_ref  : (B, 2C, HW) f32
    HW = H * W
    L = B * HW

    # Lane-concatenate the B images of this step: (C, B*HW).  HW is a multiple
    # of 128 at the target shapes, so this is a clean lane-tile concatenation.
    if B == 1:
        xcat = x_ref[0]
    else:
        xcat = jnp.concatenate([x_ref[b] for b in range(B)], axis=-1)

    # K-chunked im2col + matmul accumulation (one chunk per kernel row dh).
    acc = None
    for dh in range(5):
        rows = []
        for dw in range(5):
            tap = dh * 5 + dw
            s = (dh - 2) * W + (dw - 2)          # flat in-image shift of tap
            sh = (-s) % L                        # roll amount (non-negative)
            patch = pltpu.roll(xcat, sh, 1) if sh else xcat   # XLU lane rotate
            if not (dh == 2 and dw == 2):        # centre tap: always valid
                patch = patch * mask_ref[pl.ds(tap, 1), :]    # f32 mask
            rows.append(patch.astype(jnp.bfloat16))
        p_chunk = jnp.concatenate(rows, axis=0)               # (5C, B*HW) bf16
        part = jnp.dot(wf_ref[dh], p_chunk,
                       preferred_element_type=jnp.float32)    # (2C, B*HW) f32
        acc = part if acc is None else acc + part

    # Residual (x added to both conv branches), folded bias+BN affine, ReLU.
    scale = scale_ref[...]
    offs = offs_ref[...]
    for b in range(B):
        xb = x_ref[b]                                          # (C, HW) f32
        accb = acc[:, b * HW:(b + 1) * HW]                     # (2C, HW)
        yb = (accb + jnp.concatenate([xb, xb], axis=0)) * scale + offs
        out_ref[b] = jnp.maximum(yb, 0.0).astype(out_ref.dtype)  # lane-dense


def _choose_batch(n_img, hw):
    """Images per grid step.

    Keep >= 2 grid steps so dimension_semantics=('parallel',) can shard across
    v7x's two TensorCores, cap the per-step matmul lane width (~2048 lanes is
    plenty to amortize MXU ramp/drain without blowing up vreg/VMEM pressure),
    and require the batch to divide the image count (no remainder step)."""
    bmax = max(1, 2048 // hw)
    b = min(bmax, max(1, n_img // 2))
    while n_img % b:
        b -= 1
    return b


def res_multi_conv(x_nchw, w3, b3, w5, b5, gamma, beta, mean, var):
    """x_nchw: (N, C, H, W) f32; w3/w5 in PyTorch OIHW layout.

    Returns (N, 2C, H, W) f32 = relu(BN(cat([conv3(x)+x, conv5(x)+x], ch)))."""
    N, C, H, W = x_nchw.shape
    HW = H * W
    B = _choose_batch(N, HW)
    L = B * HW

    # Fused weight: embed 3x3 at the centre of a 5x5, stack along Cout, reorder
    # to (dh, Cout, dw*Cin) so each dh-chunk is a clean leading-axis slice.
    # (At much larger C, splitting the zero-embedded 3x3 into its own 9C matmul
    # would save MXU K-cycles; not worth it at these overhead-bound sizes.)
    w3e = jnp.zeros((C, C, 5, 5), w3.dtype).at[:, :, 1:4, 1:4].set(w3)
    wcat = jnp.concatenate([w3e, w5], axis=0)                  # (2C, C, 5, 5)
    wf = jnp.transpose(wcat, (2, 0, 3, 1)).reshape(5, 2 * C, 5 * C)
    wf = wf.astype(jnp.bfloat16)

    # Fold conv bias + eval-mode BatchNorm into a single per-channel affine.
    scale = gamma * lax.rsqrt(var + EPS)                       # (2C,)
    offs = (jnp.concatenate([b3, b5], axis=0) - mean) * scale + beta
    scale2 = scale.reshape(2 * C, 1).astype(jnp.float32)
    offs2 = offs.reshape(2 * C, 1).astype(jnp.float32)

    # Per-tap validity mask over BOTH H and W boundaries (pltpu.roll wraps
    # rather than zero-filling), tiled across the B lane-concatenated images.
    p = jnp.arange(HW, dtype=jnp.int32)
    hh, ww = p // W, p % W
    rows = []
    for dh in range(5):
        for dw in range(5):
            rows.append((hh + dh - 2 >= 0) & (hh + dh - 2 < H) &
                        (ww + dw - 2 >= 0) & (ww + dw - 2 < W))
    masks = jnp.stack(rows, axis=0).astype(jnp.float32)        # (25, HW)
    if B > 1:
        masks = jnp.tile(masks, (1, B))                        # (25, B*HW)

    x_flat = x_nchw.reshape(N, C, HW)                          # free reshape

    kernel = functools.partial(_res_multi_conv_kernel, B=B, C=C, H=H, W=W)
    out = pl.pallas_call(
        kernel,
        out_shape=jax.ShapeDtypeStruct((N, 2 * C, HW), jnp.float32),
        grid_spec=pltpu.PrefetchScalarGridSpec(
            num_scalar_prefetch=0,
            grid=(N // B,),
            in_specs=[
                pl.BlockSpec((B, C, HW), lambda n: (n, 0, 0)),
                pl.BlockSpec((5, 2 * C, 5 * C), lambda n: (0, 0, 0)),
                pl.BlockSpec((2 * C, 1), lambda n: (0, 0)),
                pl.BlockSpec((2 * C, 1), lambda n: (0, 0)),
                pl.BlockSpec((25, L), lambda n: (0, 0)),
            ],
            out_specs=pl.BlockSpec((B, 2 * C, HW), lambda n: (n, 0, 0)),
        ),
        compiler_params=pltpu.CompilerParams(
            dimension_semantics=("parallel",),
            vmem_limit_bytes=32 * 1024 * 1024),
    )(x_flat, wf, scale2, offs2, masks)

    return out.reshape(N, 2 * C, H, W)                         # free reshape


def _reference(x, w3, b3, w5, b5, gamma, beta, mean, var):
    """Pure-JAX reference mirroring the PyTorch forward (eval-mode BN).

    Conv operands are rounded to bf16 exactly as in the kernel so the
    comparison isolates kernel correctness rather than bf16 rounding."""
    dn = ('NCHW', 'OIHW', 'NCHW')
    xq = x.astype(jnp.bfloat16).astype(jnp.float32)
    w3q = w3.astype(jnp.bfloat16).astype(jnp.float32)
    w5q = w5.astype(jnp.bfloat16).astype(jnp.float32)
    y3 = lax.conv_general_dilated(xq, w3q, (1, 1), [(1, 1), (1, 1)],
                                  dimension_numbers=dn,
                                  precision=lax.Precision.HIGHEST)
    y3 = y3 + b3[None, :, None, None] + x
    y5 = lax.conv_general_dilated(xq, w5q, (1, 1), [(2, 2), (2, 2)],
                                  dimension_numbers=dn,
                                  precision=lax.Precision.HIGHEST)
    y5 = y5 + b5[None, :, None, None] + x
    cat = jnp.concatenate([y3, y5], axis=1)
    bn = (cat - mean[None, :, None, None]) * (
        gamma * lax.rsqrt(var + EPS))[None, :, None, None] + beta[None, :, None, None]
    return jnp.maximum(bn, 0.0)


if __name__ == "__main__":
    # Module default channels=16; small spatial.  N=4 -> 2 images per grid
    # step, 2 grid steps (exercises both batching and the v7x 2-TC rule).
    N, C, H, W = 4, 16, 16, 16

    key = jax.random.PRNGKey(0)
    kx, k3w, k3b, k5w, k5b, kg, kb, km, kv = jax.random.split(key, 9)

    x = jax.random.normal(kx, (N, C, H, W), dtype=jnp.float32)

    # PyTorch-layout (OIHW) synthetic parameters.
    w3 = 0.1 * jax.random.normal(k3w, (C, C, 3, 3), dtype=jnp.float32)
    b3 = 0.1 * jax.random.normal(k3b, (C,), dtype=jnp.float32)
    w5 = 0.1 * jax.random.normal(k5w, (C, C, 5, 5), dtype=jnp.float32)
    b5 = 0.1 * jax.random.normal(k5b, (C,), dtype=jnp.float32)
    gamma = 1.0 + 0.1 * jax.random.normal(kg, (2 * C,), dtype=jnp.float32)
    beta = 0.1 * jax.random.normal(kb, (2 * C,), dtype=jnp.float32)
    mean = 0.1 * jax.random.normal(km, (2 * C,), dtype=jnp.float32)
    var = jax.random.uniform(kv, (2 * C,), minval=0.5, maxval=1.5,
                             dtype=jnp.float32)

    out = jax.jit(res_multi_conv)(x, w3, b3, w5, b5, gamma, beta, mean, var)
    out = jax.block_until_ready(out)

    ref = _reference(x, w3, b3, w5, b5, gamma, beta, mean, var)
    assert out.shape == (N, 2 * C, H, W), out.shape
    assert jnp.allclose(out, ref, atol=2e-3, rtol=2e-3), (
        float(jnp.max(jnp.abs(out - ref))))

    print("KERNEL_OK")
</pallas_src>

<mosaic_0001>
module attributes {stable_mosaic.version = 11 : i64} {
  func.func @_res_multi_conv_kernel(%arg0: i32, %arg1: memref<2x16x256xf32, #tpu.memory_space<vmem>>, %arg2: memref<5x32x80xbf16, #tpu.memory_space<vmem>>, %arg3: memref<32x1xf32, #tpu.memory_space<vmem>>, %arg4: memref<32x1xf32, #tpu.memory_space<vmem>>, %arg5: memref<25x512xf32, #tpu.memory_space<vmem>>, %arg6: memref<2x32x256xf32, #tpu.memory_space<vmem>>) attributes {dimension_semantics = [#tpu.dimension_semantics<parallel>], iteration_bounds = array<i64: 2>, scalar_prefetch = 0 : i64, scratch_operands = 0 : i64, tpu.core_type = #tpu.core_type<tc>, window_params = [{transform_indices = @transform_0, window_bounds = array<i64: 2, 16, 256>}, {pipeline_mode = #tpu.pipeline_mode<synchronous>, transform_indices = @transform_1, window_bounds = array<i64: 5, 32, 80>}, {pipeline_mode = #tpu.pipeline_mode<synchronous>, transform_indices = @transform_2, window_bounds = array<i64: 32, 1>}, {pipeline_mode = #tpu.pipeline_mode<synchronous>, transform_indices = @transform_3, window_bounds = array<i64: 32, 1>}, {pipeline_mode = #tpu.pipeline_mode<synchronous>, transform_indices = @transform_4, window_bounds = array<i64: 25, 512>}, {transform_indices = @transform_5, window_bounds = array<i64: 2, 32, 256>}]} {
    %c0 = arith.constant 0 : index
    %c0_0 = arith.constant 0 : index
    %c0_1 = arith.constant 0 : index
    %0 = vector.load %arg1[%c0, %c0_0, %c0_1] : memref<2x16x256xf32, #tpu.memory_space<vmem>>, vector<1x16x256xf32>
    %1 = vector.shape_cast %0 : vector<1x16x256xf32> to vector<16x256xf32>
    %c1 = arith.constant 1 : index
    %c0_2 = arith.constant 0 : index
    %c0_3 = arith.constant 0 : index
    %2 = vector.load %arg1[%c1, %c0_2, %c0_3] : memref<2x16x256xf32, #tpu.memory_space<vmem>>, vector<1x16x256xf32>
    %3 = vector.shape_cast %2 : vector<1x16x256xf32> to vector<16x256xf32>
    %4 = tpu.concatenate %1, %3 in 1 : vector<16x256xf32>, vector<16x256xf32> -> vector<16x512xf32>
    %c34_i32 = arith.constant 34 : i32
    %5 = tpu.dynamic_rotate %4 by %c34_i32 dim 1 : vector<16x512xf32>, i32 -> vector<16x512xf32>
    %c0_4 = arith.constant 0 : index
    %c0_5 = arith.constant 0 : index
    %6 = vector.load %arg5[%c0_4, %c0_5] : memref<25x512xf32, #tpu.memory_space<vmem>>, vector<1x512xf32>
    %7 = vector.broadcast %6 : vector<1x512xf32> to vector<16x512xf32>
    %8 = arith.mulf %5, %7 : vector<16x512xf32>
    %9 = arith.truncf %8 : vector<16x512xf32> to vector<16x512xbf16>
    %c33_i32 = arith.constant 33 : i32
    %10 = tpu.dynamic_rotate %4 by %c33_i32 dim 1 : vector<16x512xf32>, i32 -> vector<16x512xf32>
    %c1_6 = arith.constant 1 : index
    %c0_7 = arith.constant 0 : index
    %11 = vector.load %arg5[%c1_6, %c0_7] : memref<25x512xf32, #tpu.memory_space<vmem>>, vector<1x512xf32>
    %12 = vector.broadcast %11 : vector<1x512xf32> to vector<16x512xf32>
    %13 = arith.mulf %10, %12 : vector<16x512xf32>
    %14 = arith.truncf %13 : vector<16x512xf32> to vector<16x512xbf16>
    %c32_i32 = arith.constant 32 : i32
    %15 = tpu.dynamic_rotate %4 by %c32_i32 dim 1 : vector<16x512xf32>, i32 -> vector<16x512xf32>
    %c2 = arith.constant 2 : index
    %c0_8 = arith.constant 0 : index
    %16 = vector.load %arg5[%c2, %c0_8] : memref<25x512xf32, #tpu.memory_space<vmem>>, vector<1x512xf32>
    %17 = vector.broadcast %16 : vector<1x512xf32> to vector<16x512xf32>
    %18 = arith.mulf %15, %17 : vector<16x512xf32>
    %19 = arith.truncf %18 : vector<16x512xf32> to vector<16x512xbf16>
    %c31_i32 = arith.constant 31 : i32
    %20 = tpu.dynamic_rotate %4 by %c31_i32 dim 1 : vector<16x512xf32>, i32 -> vector<16x512xf32>
    %c3 = arith.constant 3 : index
    %c0_9 = arith.constant 0 : index
    %21 = vector.load %arg5[%c3, %c0_9] : memref<25x512xf32, #tpu.memory_space<vmem>>, vector<1x512xf32>
    %22 = vector.broadcast %21 : vector<1x512xf32> to vector<16x512xf32>
    %23 = arith.mulf %20, %22 : vector<16x512xf32>
    %24 = arith.truncf %23 : vector<16x512xf32> to vector<16x512xbf16>
    %c30_i32 = arith.constant 30 : i32
    %25 = tpu.dynamic_rotate %4 by %c30_i32 dim 1 : vector<16x512xf32>, i32 -> vector<16x512xf32>
    %c4 = arith.constant 4 : index
    %c0_10 = arith.constant 0 : index
    %26 = vector.load %arg5[%c4, %c0_10] : memref<25x512xf32, #tpu.memory_space<vmem>>, vector<1x512xf32>
    %27 = vector.broadcast %26 : vector<1x512xf32> to vector<16x512xf32>
    %28 = arith.mulf %25, %27 : vector<16x512xf32>
    %29 = arith.truncf %28 : vector<16x512xf32> to vector<16x512xbf16>
    %30 = tpu.concatenate %9, %14, %19, %24, %29 in 0 : vector<16x512xbf16>, vector<16x512xbf16>, vector<16x512xbf16>, vector<16x512xbf16>, vector<16x512xbf16> -> vector<80x512xbf16>
    %c0_11 = arith.constant 0 : index
    %c0_12 = arith.constant 0 : index
    %c0_13 = arith.constant 0 : index
    %31 = vector.load %arg2[%c0_11, %c0_12, %c0_13] : memref<5x32x80xbf16, #tpu.memory_space<vmem>>, vector<1x32x80xbf16>
    %32 = vector.shape_cast %31 : vector<1x32x80xbf16> to vector<32x80xbf16>
    %cst = arith.constant dense<0.000000e+00> : vector<32x512xf32>
    %33 = tpu.matmul %32, %30, %cst {dimension_numbers = #tpu.dot_dimension_numbers<[1], [0], [0], [1], [0, 0, 1, 1], [], []>} : vector<32x80xbf16>, vector<80x512xbf16>, vector<32x512xf32> -> vector<32x512xf32>
    %c18_i32 = arith.constant 18 : i32
    %34 = tpu.dynamic_rotate %4 by %c18_i32 dim 1 : vector<16x512xf32>, i32 -> vector<16x512xf32>
    %c5 = arith.constant 5 : index
    %c0_14 = arith.constant 0 : index
    %35 = vector.load %arg5[%c5, %c0_14] : memref<25x512xf32, #tpu.memory_space<vmem>>, vector<1x512xf32>
    %36 = vector.broadcast %35 : vector<1x512xf32> to vector<16x512xf32>
    %37 = arith.mulf %34, %36 : vector<16x512xf32>
    %38 = arith.truncf %37 : vector<16x512xf32> to vector<16x512xbf16>
    %c17_i32 = arith.constant 17 : i32
    %39 = tpu.dynamic_rotate %4 by %c17_i32 dim 1 : vector<16x512xf32>, i32 -> vector<16x512xf32>
    %c6 = arith.constant 6 : index
    %c0_15 = arith.constant 0 : index
    %40 = vector.load %arg5[%c6, %c0_15] : memref<25x512xf32, #tpu.memory_space<vmem>>, vector<1x512xf32>
    %41 = vector.broadcast %40 : vector<1x512xf32> to vector<16x512xf32>
    %42 = arith.mulf %39, %41 : vector<16x512xf32>
    %43 = arith.truncf %42 : vector<16x512xf32> to vector<16x512xbf16>
    %c16_i32 = arith.constant 16 : i32
    %44 = tpu.dynamic_rotate %4 by %c16_i32 dim 1 : vector<16x512xf32>, i32 -> vector<16x512xf32>
    %c7 = arith.constant 7 : index
    %c0_16 = arith.constant 0 : index
    %45 = vector.load %arg5[%c7, %c0_16] : memref<25x512xf32, #tpu.memory_space<vmem>>, vector<1x512xf32>
    %46 = vector.broadcast %45 : vector<1x512xf32> to vector<16x512xf32>
    %47 = arith.mulf %44, %46 : vector<16x512xf32>
    %48 = arith.truncf %47 : vector<16x512xf32> to vector<16x512xbf16>
    %c15_i32 = arith.constant 15 : i32
    %49 = tpu.dynamic_rotate %4 by %c15_i32 dim 1 : vector<16x512xf32>, i32 -> vector<16x512xf32>
    %c8 = arith.constant 8 : index
    %c0_17 = arith.constant 0 : index
    %50 = vector.load %arg5[%c8, %c0_17] : memref<25x512xf32, #tpu.memory_space<vmem>>, vector<1x512xf32>
    %51 = vector.broadcast %50 : vector<1x512xf32> to vector<16x512xf32>
    %52 = arith.mulf %49, %51 : vector<16x512xf32>
    %53 = arith.truncf %52 : vector<16x512xf32> to vector<16x512xbf16>
    %c14_i32 = arith.constant 14 : i32
    %54 = tpu.dynamic_rotate %4 by %c14_i32 dim 1 : vector<16x512xf32>, i32 -> vector<16x512xf32>
    %c9 = arith.constant 9 : index
    %c0_18 = arith.constant 0 : index
    %55 = vector.load %arg5[%c9, %c0_18] : memref<25x512xf32, #tpu.memory_space<vmem>>, vector<1x512xf32>
    %56 = vector.broadcast %55 : vector<1x512xf32> to vector<16x512xf32>
    %57 = arith.mulf %54, %56 : vector<16x512xf32>
    %58 = arith.truncf %57 : vector<16x512xf32> to vector<16x512xbf16>
    %59 = tpu.concatenate %38, %43, %48, %53, %58 in 0 : vector<16x512xbf16>, vector<16x512xbf16>, vector<16x512xbf16>, vector<16x512xbf16>, vector<16x512xbf16> -> vector<80x512xbf16>
    %c1_19 = arith.constant 1 : index
    %c0_20 = arith.constant 0 : index
    %c0_21 = arith.constant 0 : index
    %60 = vector.load %arg2[%c1_19, %c0_20, %c0_21] : memref<5x32x80xbf16, #tpu.memory_space<vmem>>, vector<1x32x80xbf16>
    %61 = vector.shape_cast %60 : vector<1x32x80xbf16> to vector<32x80xbf16>
    %cst_22 = arith.constant dense<0.000000e+00> : vector<32x512xf32>
    %62 = tpu.matmul %61, %59, %cst_22 {dimension_numbers = #tpu.dot_dimension_numbers<[1], [0], [0], [1], [0, 0, 1, 1], [], []>} : vector<32x80xbf16>, vector<80x512xbf16>, vector<32x512xf32> -> vector<32x512xf32>
    %63 = arith.addf %33, %62 : vector<32x512xf32>
    %c2_i32 = arith.constant 2 : i32
    %64 = tpu.dynamic_rotate %4 by %c2_i32 dim 1 : vector<16x512xf32>, i32 -> vector<16x512xf32>
    %c10 = arith.constant 10 : index
    %c0_23 = arith.constant 0 : index
    %65 = vector.load %arg5[%c10, %c0_23] : memref<25x512xf32, #tpu.memory_space<vmem>>, vector<1x512xf32>
    %66 = vector.broadcast %65 : vector<1x512xf32> to vector<16x512xf32>
    %67 = arith.mulf %64, %66 : vector<16x512xf32>
    %68 = arith.truncf %67 : vector<16x512xf32> to vector<16x512xbf16>
    %c1_i32 = arith.constant 1 : i32
    %69 = tpu.dynamic_rotate %4 by %c1_i32 dim 1 : vector<16x512xf32>, i32 -> vector<16x512xf32>
    %c11 = arith.constant 11 : index
    %c0_24 = arith.constant 0 : index
    %70 = vector.load %arg5[%c11, %c0_24] : memref<25x512xf32, #tpu.memory_space<vmem>>, vector<1x512xf32>
    %71 = vector.broadcast %70 : vector<1x512xf32> to vector<16x512xf32>
    %72 = arith.mulf %69, %71 : vector<16x512xf32>
    %73 = arith.truncf %72 : vector<16x512xf32> to vector<16x512xbf16>
    %74 = arith.truncf %4 : vector<16x512xf32> to vector<16x512xbf16>
    %c511_i32 = arith.constant 511 : i32
    %75 = tpu.dynamic_rotate %4 by %c511_i32 dim 1 : vector<16x512xf32>, i32 -> vector<16x512xf32>
    %c13 = arith.constant 13 : index
    %c0_25 = arith.constant 0 : index
    %76 = vector.load %arg5[%c13, %c0_25] : memref<25x512xf32, #tpu.memory_space<vmem>>, vector<1x512xf32>
    %77 = vector.broadcast %76 : vector<1x512xf32> to vector<16x512xf32>
    %78 = arith.mulf %75, %77 : vector<16x512xf32>
    %79 = arith.truncf %78 : vector<16x512xf32> to vector<16x512xbf16>
    %c510_i32 = arith.constant 510 : i32
    %80 = tpu.dynamic_rotate %4 by %c510_i32 dim 1 : vector<16x512xf32>, i32 -> vector<16x512xf32>
    %c14 = arith.constant 14 : index
    %c0_26 = arith.constant 0 : index
    %81 = vector.load %arg5[%c14, %c0_26] : memref<25x512xf32, #tpu.memory_space<vmem>>, vector<1x512xf32>
    %82 = vector.broadcast %81 : vector<1x512xf32> to vector<16x512xf32>
    %83 = arith.mulf %80, %82 : vector<16x512xf32>
    %84 = arith.truncf %83 : vector<16x512xf32> to vector<16x512xbf16>
    %85 = tpu.concatenate %68, %73, %74, %79, %84 in 0 : vector<16x512xbf16>, vector<16x512xbf16>, vector<16x512xbf16>, vector<16x512xbf16>, vector<16x512xbf16> -> vector<80x512xbf16>
    %c2_27 = arith.constant 2 : index
    %c0_28 = arith.constant 0 : index
    %c0_29 = arith.constant 0 : index
    %86 = vector.load %arg2[%c2_27, %c0_28, %c0_29] : memref<5x32x80xbf16, #tpu.memory_space<vmem>>, vector<1x32x80xbf16>
    %87 = vector.shape_cast %86 : vector<1x32x80xbf16> to vector<32x80xbf16>
    %cst_30 = arith.constant dense<0.000000e+00> : vector<32x512xf32>
    %88 = tpu.matmul %87, %85, %cst_30 {dimension_numbers = #tpu.dot_dimension_numbers<[1], [0], [0], [1], [0, 0, 1, 1], [], []>} : vector<32x80xbf16>, vector<80x512xbf16>, vector<32x512xf32> -> vector<32x512xf32>
    %89 = arith.addf %63, %88 : vector<32x512xf32>
    %c498_i32 = arith.constant 498 : i32
    %90 = tpu.dynamic_rotate %4 by %c498_i32 dim 1 : vector<16x512xf32>, i32 -> vector<16x512xf32>
    %c15 = arith.constant 15 : index
    %c0_31 = arith.constant 0 : index
    %91 = vector.load %arg5[%c15, %c0_31] : memref<25x512xf32, #tpu.memory_space<vmem>>, vector<1x512xf32>
    %92 = vector.broadcast %91 : vector<1x512xf32> to vector<16x512xf32>
    %93 = arith.mulf %90, %92 : vector<16x512xf32>
    %94 = arith.truncf %93 : vector<16x512xf32> to vector<16x512xbf16>
    %c497_i32 = arith.constant 497 : i32
    %95 = tpu.dynamic_rotate %4 by %c497_i32 dim 1 : vector<16x512xf32>, i32 -> vector<16x512xf32>
    %c16 = arith.constant 16 : index
    %c0_32 = arith.constant 0 : index
    %96 = vector.load %arg5[%c16, %c0_32] : memref<25x512xf32, #tpu.memory_space<vmem>>, vector<1x512xf32>
    %97 = vector.broadcast %96 : vector<1x512xf32> to vector<16x512xf32>
    %98 = arith.mulf %95, %97 : vector<16x512xf32>
    %99 = arith.truncf %98 : vector<16x512xf32> to vector<16x512xbf16>
    %c496_i32 = arith.constant 496 : i32
    %100 = tpu.dynamic_rotate %4 by %c496_i32 dim 1 : vector<16x512xf32>, i32 -> vector<16x512xf32>
    %c17 = arith.constant 17 : index
    %c0_33 = arith.constant 0 : index
    %101 = vector.load %arg5[%c17, %c0_33] : memref<25x512xf32, #tpu.memory_space<vmem>>, vector<1x512xf32>
    %102 = vector.broadcast %101 : vector<1x512xf32> to vector<16x512xf32>
    %103 = arith.mulf %100, %102 : vector<16x512xf32>
    %104 = arith.truncf %103 : vector<16x512xf32> to vector<16x512xbf16>
    %c495_i32 = arith.constant 495 : i32
    %105 = tpu.dynamic_rotate %4 by %c495_i32 dim 1 : vector<16x512xf32>, i32 -> vector<16x512xf32>
    %c18 = arith.constant 18 : index
    %c0_34 = arith.constant 0 : index
    %106 = vector.load %arg5[%c18, %c0_34] : memref<25x512xf32, #tpu.memory_space<vmem>>, vector<1x512xf32>
    %107 = vector.broadcast %106 : vector<1x512xf32> to vector<16x512xf32>
    %108 = arith.mulf %105, %107 : vector<16x512xf32>
    %109 = arith.truncf %108 : vector<16x512xf32> to vector<16x512xbf16>
    %c494_i32 = arith.constant 494 : i32
    %110 = tpu.dynamic_rotate %4 by %c494_i32 dim 1 : vector<16x512xf32>, i32 -> vector<16x512xf32>
    %c19 = arith.constant 19 : index
    %c0_35 = arith.constant 0 : index
    %111 = vector.load %arg5[%c19, %c0_35] : memref<25x512xf32, #tpu.memory_space<vmem>>, vector<1x512xf32>
    %112 = vector.broadcast %111 : vector<1x512xf32> to vector<16x512xf32>
    %113 = arith.mulf %110, %112 : vector<16x512xf32>
    %114 = arith.truncf %113 : vector<16x512xf32> to vector<16x512xbf16>
    %115 = tpu.concatenate %94, %99, %104, %109, %114 in 0 : vector<16x512xbf16>, vector<16x512xbf16>, vector<16x512xbf16>, vector<16x512xbf16>, vector<16x512xbf16> -> vector<80x512xbf16>
    %c3_36 = arith.constant 3 : index
    %c0_37 = arith.constant 0 : index
    %c0_38 = arith.constant 0 : index
    %116 = vector.load %arg2[%c3_36, %c0_37, %c0_38] : memref<5x32x80xbf16, #tpu.memory_space<vmem>>, vector<1x32x80xbf16>
    %117 = vector.shape_cast %116 : vector<1x32x80xbf16> to vector<32x80xbf16>
    %cst_39 = arith.constant dense<0.000000e+00> : vector<32x512xf32>
    %118 = tpu.matmul %117, %115, %cst_39 {dimension_numbers = #tpu.dot_dimension_numbers<[1], [0], [0], [1], [0, 0, 1, 1], [], []>} : vector<32x80xbf16>, vector<80x512xbf16>, vector<32x512xf32> -> vector<32x512xf32>
    %119 = arith.addf %89, %118 : vector<32x512xf32>
    %c482_i32 = arith.constant 482 : i32
    %120 = tpu.dynamic_rotate %4 by %c482_i32 dim 1 : vector<16x512xf32>, i32 -> vector<16x512xf32>
    %c20 = arith.constant 20 : index
    %c0_40 = arith.constant 0 : index
    %121 = vector.load %arg5[%c20, %c0_40] : memref<25x512xf32, #tpu.memory_space<vmem>>, vector<1x512xf32>
    %122 = vector.broadcast %121 : vector<1x512xf32> to vector<16x512xf32>
    %123 = arith.mulf %120, %122 : vector<16x512xf32>
    %124 = arith.truncf %123 : vector<16x512xf32> to vector<16x512xbf16>
    %c481_i32 = arith.constant 481 : i32
    %125 = tpu.dynamic_rotate %4 by %c481_i32 dim 1 : vector<16x512xf32>, i32 -> vector<16x512xf32>
    %c21 = arith.constant 21 : index
    %c0_41 = arith.constant 0 : index
    %126 = vector.load %arg5[%c21, %c0_41] : memref<25x512xf32, #tpu.memory_space<vmem>>, vector<1x512xf32>
    %127 = vector.broadcast %126 : vector<1x512xf32> to vector<16x512xf32>
    %128 = arith.mulf %125, %127 : vector<16x512xf32>
    %129 = arith.truncf %128 : vector<16x512xf32> to vector<16x512xbf16>
    %c480_i32 = arith.constant 480 : i32
    %130 = tpu.dynamic_rotate %4 by %c480_i32 dim 1 : vector<16x512xf32>, i32 -> vector<16x512xf32>
    %c22 = arith.constant 22 : index
    %c0_42 = arith.constant 0 : index
    %131 = vector.load %arg5[%c22, %c0_42] : memref<25x512xf32, #tpu.memory_space<vmem>>, vector<1x512xf32>
    %132 = vector.broadcast %131 : vector<1x512xf32> to vector<16x512xf32>
    %133 = arith.mulf %130, %132 : vector<16x512xf32>
    %134 = arith.truncf %133 : vector<16x512xf32> to vector<16x512xbf16>
    %c479_i32 = arith.constant 479 : i32
    %135 = tpu.dynamic_rotate %4 by %c479_i32 dim 1 : vector<16x512xf32>, i32 -> vector<16x512xf32>
    %c23 = arith.constant 23 : index
    %c0_43 = arith.constant 0 : index
    %136 = vector.load %arg5[%c23, %c0_43] : memref<25x512xf32, #tpu.memory_space<vmem>>, vector<1x512xf32>
    %137 = vector.broadcast %136 : vector<1x512xf32> to vector<16x512xf32>
    %138 = arith.mulf %135, %137 : vector<16x512xf32>
    %139 = arith.truncf %138 : vector<16x512xf32> to vector<16x512xbf16>
    %c478_i32 = arith.constant 478 : i32
    %140 = tpu.dynamic_rotate %4 by %c478_i32 dim 1 : vector<16x512xf32>, i32 -> vector<16x512xf32>
    %c24 = arith.constant 24 : index
    %c0_44 = arith.constant 0 : index
    %141 = vector.load %arg5[%c24, %c0_44] : memref<25x512xf32, #tpu.memory_space<vmem>>, vector<1x512xf32>
    %142 = vector.broadcast %141 : vector<1x512xf32> to vector<16x512xf32>
    %143 = arith.mulf %140, %142 : vector<16x512xf32>
    %144 = arith.truncf %143 : vector<16x512xf32> to vector<16x512xbf16>
    %145 = tpu.concatenate %124, %129, %134, %139, %144 in 0 : vector<16x512xbf16>, vector<16x512xbf16>, vector<16x512xbf16>, vector<16x512xbf16>, vector<16x512xbf16> -> vector<80x512xbf16>
    %c4_45 = arith.constant 4 : index
    %c0_46 = arith.constant 0 : index
    %c0_47 = arith.constant 0 : index
    %146 = vector.load %arg2[%c4_45, %c0_46, %c0_47] : memref<5x32x80xbf16, #tpu.memory_space<vmem>>, vector<1x32x80xbf16>
    %147 = vector.shape_cast %146 : vector<1x32x80xbf16> to vector<32x80xbf16>
    %cst_48 = arith.constant dense<0.000000e+00> : vector<32x512xf32>
    %148 = tpu.matmul %147, %145, %cst_48 {dimension_numbers = #tpu.dot_dimension_numbers<[1], [0], [0], [1], [0, 0, 1, 1], [], []>} : vector<32x80xbf16>, vector<80x512xbf16>, vector<32x512xf32> -> vector<32x512xf32>
    %149 = arith.addf %119, %148 : vector<32x512xf32>
    %c0_49 = arith.constant 0 : index
    %c0_50 = arith.constant 0 : index
    %150 = vector.load %arg3[%c0_49, %c0_50] : memref<32x1xf32, #tpu.memory_space<vmem>>, vector<32x1xf32>
    %c0_51 = arith.constant 0 : index
    %c0_52 = arith.constant 0 : index
    %151 = vector.load %arg4[%c0_51, %c0_52] : memref<32x1xf32, #tpu.memory_space<vmem>>, vector<32x1xf32>
    %c0_53 = arith.constant 0 : index
    %c0_54 = arith.constant 0 : index
    %c0_55 = arith.constant 0 : index
    %152 = vector.load %arg1[%c0_53, %c0_54, %c0_55] : memref<2x16x256xf32, #tpu.memory_space<vmem>>, vector<1x16x256xf32>
    %153 = vector.shape_cast %152 : vector<1x16x256xf32> to vector<16x256xf32>
    %154 = vector.extract_strided_slice %149 {offsets = [0, 0], sizes = [32, 256], strides = [1, 1]} : vector<32x512xf32> to vector<32x256xf32>
    %155 = tpu.concatenate %153, %153 in 0 : vector<16x256xf32>, vector<16x256xf32> -> vector<32x256xf32>
    %156 = arith.addf %154, %155 : vector<32x256xf32>
    %157 = vector.broadcast %150 : vector<32x1xf32> to vector<32x256xf32>
    %158 = arith.mulf %156, %157 : vector<32x256xf32>
    %159 = vector.broadcast %151 : vector<32x1xf32> to vector<32x256xf32>
    %160 = arith.addf %158, %159 : vector<32x256xf32>
    %cst_56 = arith.constant 0.000000e+00 : f32
    %161 = vector.broadcast %cst_56 : f32 to vector<32x256xf32>
    %162 = arith.maximumf %160, %161 : vector<32x256xf32>
    %c0_57 = arith.constant 0 : index
    %c0_58 = arith.constant 0 : index
    %c0_59 = arith.constant 0 : index
    %163 = vector.load %arg6[%c0_57, %c0_58, %c0_59] : memref<2x32x256xf32, #tpu.memory_space<vmem>>, vector<1x32x256xf32>
    %164 = vector.shape_cast %163 : vector<1x32x256xf32> to vector<32x256xf32>
    %165 = vector.shape_cast %162 : vector<32x256xf32> to vector<1x32x256xf32>
    tpu.vector_store %arg6[%c0_57, %c0_58, %c0_59], %165 {strides = array<i32>} : memref<2x32x256xf32, #tpu.memory_space<vmem>>, vector<1x32x256xf32>,
    %c1_60 = arith.constant 1 : index
    %c0_61 = arith.constant 0 : index
    %c0_62 = arith.constant 0 : index
    %166 = vector.load %arg1[%c1_60, %c0_61, %c0_62] : memref<2x16x256xf32, #tpu.memory_space<vmem>>, vector<1x16x256xf32>
    %167 = vector.shape_cast %166 : vector<1x16x256xf32> to vector<16x256xf32>
    %168 = vector.extract_strided_slice %149 {offsets = [0, 256], sizes = [32, 256], strides = [1, 1]} : vector<32x512xf32> to vector<32x256xf32>
    %169 = tpu.concatenate %167, %167 in 0 : vector<16x256xf32>, vector<16x256xf32> -> vector<32x256xf32>
    %170 = arith.addf %168, %169 : vector<32x256xf32>
    %171 = vector.broadcast %150 : vector<32x1xf32> to vector<32x256xf32>
    %172 = arith.mulf %170, %171 : vector<32x256xf32>
    %173 = vector.broadcast %151 : vector<32x1xf32> to vector<32x256xf32>
    %174 = arith.addf %172, %173 : vector<32x256xf32>
    %cst_63 = arith.constant 0.000000e+00 : f32
    %175 = vector.broadcast %cst_63 : f32 to vector<32x256xf32>
    %176 = arith.maximumf %174, %175 : vector<32x256xf32>
    %c1_64 = arith.constant 1 : index
    %c0_65 = arith.constant 0 : index
    %c0_66 = arith.constant 0 : index
    %177 = vector.load %arg6[%c1_64, %c0_65, %c0_66] : memref<2x32x256xf32, #tpu.memory_space<vmem>>, vector<1x32x256xf32>
    %178 = vector.shape_cast %177 : vector<1x32x256xf32> to vector<32x256xf32>
    %179 = vector.shape_cast %176 : vector<32x256xf32> to vector<1x32x256xf32>
    tpu.vector_store %arg6[%c1_64, %c0_65, %c0_66], %179 {strides = array<i32>} : memref<2x32x256xf32, #tpu.memory_space<vmem>>, vector<1x32x256xf32>,
    return
  }
  func.func @transform_0(%arg0: i32) -> (i32, i32, i32) {
    %c0_i32 = arith.constant 0 : i32
    %c0_i32_0 = arith.constant 0 : i32
    %c0_i32_1 = arith.constant 0 : i32
    return %arg0, %c0_i32, %c0_i32_0 : i32, i32, i32
  }
  func.func @transform_1(%arg0: i32) -> (i32, i32, i32) {
    %c0_i32 = arith.constant 0 : i32
    %c0_i32_0 = arith.constant 0 : i32
    %c0_i32_1 = arith.constant 0 : i32
    %c0_i32_2 = arith.constant 0 : i32
    return %c0_i32, %c0_i32_0, %c0_i32_1 : i32, i32, i32
  }
  func.func @transform_2(%arg0: i32) -> (i32, i32) {
    %c0_i32 = arith.constant 0 : i32
    %c0_i32_0 = arith.constant 0 : i32
    %c0_i32_1 = arith.constant 0 : i32
    return %c0_i32, %c0_i32_0 : i32, i32
  }
  func.func @transform_3(%arg0: i32) -> (i32, i32) {
    %c0_i32 = arith.constant 0 : i32
    %c0_i32_0 = arith.constant 0 : i32
    %c0_i32_1 = arith.constant 0 : i32
    return %c0_i32, %c0_i32_0 : i32, i32
  }
  func.func @transform_4(%arg0: i32) -> (i32, i32) {
    %c0_i32 = arith.constant 0 : i32
    %c0_i32_0 = arith.constant 0 : i32
    %c0_i32_1 = arith.constant 0 : i32
    return %c0_i32, %c0_i32_0 : i32, i32
  }
  func.func @transform_5(%arg0: i32) -> (i32, i32, i32) {
    %c0_i32 = arith.constant 0 : i32
    %c0_i32_0 = arith.constant 0 : i32
    %c0_i32_1 = arith.constant 0 : i32
    return %arg0, %c0_i32, %c0_i32_0 : i32, i32, i32
  }
}

</mosaic_0001>

<bundles_post_ra>
// kernel: res_multi_conv.1
= control target key start
LH: loop header
LB: loop body
LE: loop exit
PB: predicated region body
PF: predicated region fallthrough
CT: control target
= control target key end

     0   :  { %s2782_s18 = smov 0   ;;  %s4072_s0 = inlined_call_operand.vmem [shape: f32[4,16,256], index: 0, kind: input, shape index: {}]   ;;  %s4073_s1 = inlined_call_operand.vmem [shape: bf16[5,32,80], index: 1, kind: input, shape index: {}]   ;;  %s4074_s2 = inlined_call_operand.vmem [shape: f32[32,1], index: 2, kind: input, shape index: {}]   ;;  %s4075_s3 = inlined_call_operand.vmem [shape: f32[32,1], index: 3, kind: input, shape index: {}]   ;;  %s4076_s4 = inlined_call_operand.vmem [shape: f32[25,512], index: 4, kind: input, shape index: {}]   ;;  %s4077_s5 = inlined_call_operand.vmem [shape: f32[4,32,256], index: 5, kind: output, shape index: {}]  }
   0x1 LB: > { %s2562_s19 = sadd.s32 4294967295, %s2725_s18   ;;  %p2566_p0 = scmp.ge.s32.totalorder %s2725_s18, 1  ;;  %s2725_s18 = sphi %s2782_s18, %s15_s18  }
   0x2   : > { %p189_p1 = scmp.lt.s32.totalorder %s2725_s18, 3 }
   0x4   : > { %p190_p2 = pnand %p2566_p0, %p189_p1 }
   0x6   : > { %193 = sbr.rel (%p190_p2) target bundleno = 742 (0x2e6), region = 40 }
   0xb   : > { %s2567_s20 = sshll.u32 %s2562_s19, 1  ;;  %s2727_s25 = smov 34   ;;  %v2736_v12 = vmov 0   ;;  %v259_v23 = vlaneseq  ;;  %v2585_v29 = vld [vmem:[%s4076_s4 + $0x21] ss:$8 sm:$0xf] }
   0xc   : > { %p220_p3 = scmp.lt.s32.totalorder %s2567_s20, 3  ;;  %s2728_s26 = smov 33   ;;  %902 = vmatprep.mubr.bf16.mxu0 %v2736_v12  ;;  %955 = vmatprep.mubr.bf16.mxu1 %v2736_v12  ;;  %vm863_vm6 = vcmask 654336  }
   0xd   : > { %s2729_s27 = smov 32   ;;  %s2730_s28 = smov 14   ;;  %2696 = vset.pattern.permute.xlu1 %v2736_v12  ;;  %2695 = vset.pattern.permute.xlu0 %v2736_v12  ;;  %v273_v26 = vshrl.u32 %v259_v23, 7  ;;  %v2945_v30 = vand.u32 127, %v259_v23 }
   0xe   : > { %s4098_s20 = smov (!%p220_p3, %s2567_s20), 3  ;;  %s2731_s29 = smov 15   ;;  %v2584_v23 = vld [vmem:[%s4076_s4 + $0x20] ss:$8 sm:$0xf] }
   0xf   : > { %s2660_s21 = sshll.u32 %s4098_s20, 5  ;;  %s2732_s30 = smov 16   ;;  %v2947_v31 = vsub.s32 1, %v273_v26  ;;  %vm804_vm0 = vcmp.lt.s32.totalorder %v2945_v30, 14  ;;  %v2959_v39 = vsub.s32 2, %v273_v26  ;;  %v2965_v42 = vsub.s32 0, %v273_v26 }
  0x10   : > { %s2796_s24 = scalar_lea.vmem %s4072_s0, %s2660_s21  ;;  %s2733_s6 = smov 17   ;;  %v2967_v43 = vsub.s32 3, %v273_v26  ;;  %vm744_vm1 = vcmp.lt.s32.totalorder %v2945_v30, 15  ;;  %vm684_vm2 = vcmp.lt.s32.totalorder %v2945_v30, 16  ;;  %vm624_vm3 = vcmp.lt.s32.totalorder %v2945_v30, 17 }
  0x11   : > { %v2799_v0 = vld [vmem:[%s2796_s24 + $0x8] sm:$0xff]  ;;  %v2802_v1 = vld [vmem:[%s2796_s24] sm:$0xff]  ;;  %v2807_v2 = vld [vmem:[%s2796_s24 + $0x18] sm:$0xff]  ;;  %s2734_s7 = smov 18   ;;  %s2735_s8 = smov 30   ;;  %v823_v34 = vrot.slane %v2585_v29, %v2947_v31  ;;  %v827_v47 = vrot.slane %v2585_v29, %v2959_v39  ;;  %v819_v50 = vrot.slane %v2585_v29, %v2965_v42  ;;  %vm564_vm4 = vcmp.lt.s32.totalorder %v2945_v30, 18 }
  0x12   : > { %247 = vrot.lane.b32.xlu1 %v2799_v0, %s2727_s25  ;;  %243 = vrot.lane.b32.xlu0 %v2802_v1, %s2727_s25  ;;  %v2810_v3 = vld [vmem:[%s2796_s24 + $0x10] sm:$0xff]  ;;  %v2818_v5 = vld [vmem:[%s2796_s24 + $0x20] sm:$0xff]  ;;  %s2737_s9 = smov 31   ;;  %s2738_s12 = smov 126   ;;  %v831_v51 = vrot.slane %v2585_v29, %v2967_v43  ;;  %vm500_vm5 = vcmp.lt.s32.totalorder %v2945_v30, 30  ;;  %vm440_vm7 = vcmp.lt.s32.totalorder %v2945_v30, 31 }
  0x13   : > { %v2815_v4 = vld [vmem:[%s2796_s24 + $0x30] sm:$0xff]  ;;  %v2823_v6 = vld [vmem:[%s2796_s24 + $0x38] sm:$0xff]  ;;  %v2826_v7 = vld [vmem:[%s2796_s24 + $0x28] sm:$0xff]  ;;  %s2739_s15 = smov 127   ;;  %s2740_s19 = smov 1   ;;  %vm261_vm8 = vcmp.lt.s32.totalorder %v2945_v30, 34 }
  0x14   : > { %s2741_s23 = smov 2   ;;  %s2744_s14 = smov 112   ;;  %vm380_vm9 = vcmp.lt.s32.totalorder %v2945_v30, 32  ;;  %vm320_vm10 = vcmp.lt.s32.totalorder %v2945_v30, 33  ;;  %vm1298_vm11 = vcmp.lt.s32.totalorder %v2945_v30, 126  ;;  %vm1238_vm12 = vcmp.lt.s32.totalorder %v2945_v30, 127 }
  0x15   : > { %s2745_s21 = smov 113   ;;  %vm1174_vm13 = vcmp.lt.s32.totalorder %v2945_v30, 1  ;;  %s2748_s10 = smov 95   ;;  %vm1114_vm14 = vcmp.lt.s32.totalorder %v2945_v30, 2  ;;  %vm1741_vm15 = vcmp.lt.s32.totalorder %v2945_v30, 110 }
  0x16   : > { %249 = vrot.lane.b32.xlu1 %v2807_v2, %s2727_s25  ;;  %245 = vrot.lane.b32.xlu0 %v2810_v3, %s2727_s25  ;;  %s2749_s13 = smov 96   ;;  %s2750_s22 = smov 97  }
  0x1a   : > { %253 = vrot.lane.b32.xlu1 %v2815_v4, %s2727_s25  ;;  %251 = vrot.lane.b32.xlu0 %v2818_v5, %s2727_s25 }
  0x1e   : > { %257 = vrot.lane.b32.xlu1 %v2823_v6, %s2727_s25  ;;  %255 = vrot.lane.b32.xlu0 %v2826_v7, %s2727_s25 }
  0x22   : > { %306 = vrot.lane.b32.xlu1 %v2810_v3, %s2728_s26  ;;  %304 = vrot.lane.b32.xlu0 %v2802_v1, %s2728_s26 }
  0x26   : > { %310 = vrot.lane.b32.xlu1 %v2807_v2, %s2728_s26  ;;  %308 = vrot.lane.b32.xlu0 %v2799_v0, %s2728_s26 }
  0x2a   : > { %314 = vrot.lane.b32.xlu1 %v2815_v4, %s2728_s26  ;;  %312 = vrot.lane.b32.xlu0 %v2818_v5, %s2728_s26 }
  0x2e   : > { %318 = vrot.lane.b32.xlu1 %v2823_v6, %s2728_s26  ;;  %316 = vrot.lane.b32.xlu0 %v2826_v7, %s2728_s26  ;;  %s2751_s26 = smov 98  }
  0x32   : > { %366 = vrot.lane.b32.xlu1 %v2810_v3, %s2729_s27  ;;  %364 = vrot.lane.b32.xlu0 %v2802_v1, %s2729_s27 }
  0x36   : > { %790 = vrot.lane.b32.xlu1 %v2810_v3, %s2730_s28  ;;  %788 = vrot.lane.b32.xlu0 %v2802_v1, %s2730_s28 }
  0x3a   : > { %794 = vrot.lane.b32.xlu1 %v2807_v2, %s2730_s28  ;;  %792 = vrot.lane.b32.xlu0 %v2799_v0, %s2730_s28 }
  0x3e   : > { %798 = vrot.lane.b32.xlu1 %v2815_v4, %s2730_s28  ;;  %796 = vrot.lane.b32.xlu0 %v2818_v5, %s2730_s28 }
  0x42   : > { %802 = vrot.lane.b32.xlu1 %v2823_v6, %s2730_s28  ;;  %800 = vrot.lane.b32.xlu0 %v2826_v7, %s2730_s28 }
  0x46   : > { %730 = vrot.lane.b32.xlu1 %v2810_v3, %s2731_s29  ;;  %728 = vrot.lane.b32.xlu0 %v2802_v1, %s2731_s29 }
  0x4a   : > { %734 = vrot.lane.b32.xlu1 %v2807_v2, %s2731_s29  ;;  %732 = vrot.lane.b32.xlu0 %v2799_v0, %s2731_s29 }
  0x4e   : > { %738 = vrot.lane.b32.xlu1 %v2815_v4, %s2731_s29  ;;  %736 = vrot.lane.b32.xlu0 %v2818_v5, %s2731_s29 }
  0x52   : > { %742 = vrot.lane.b32.xlu1 %v2823_v6, %s2731_s29  ;;  %740 = vrot.lane.b32.xlu0 %v2826_v7, %s2731_s29 }
  0x56   : > { %670 = vrot.lane.b32.xlu1 %v2810_v3, %s2732_s30  ;;  %668 = vrot.lane.b32.xlu0 %v2802_v1, %s2732_s30 }
  0x5a   : > { %674 = vrot.lane.b32.xlu1 %v2807_v2, %s2732_s30  ;;  %672 = vrot.lane.b32.xlu0 %v2799_v0, %s2732_s30 }
  0x5e   : > { %678 = vrot.lane.b32.xlu1 %v2815_v4, %s2732_s30  ;;  %676 = vrot.lane.b32.xlu0 %v2818_v5, %s2732_s30 }
  0x62   : > { %682 = vrot.lane.b32.xlu1 %v2823_v6, %s2732_s30  ;;  %680 = vrot.lane.b32.xlu0 %v2826_v7, %s2732_s30 }
  0x66   : > { %610 = vrot.lane.b32.xlu1 %v2810_v3, %s2733_s6  ;;  %608 = vrot.lane.b32.xlu0 %v2802_v1, %s2733_s6 }
  0x6a   : > { %614 = vrot.lane.b32.xlu1 %v2807_v2, %s2733_s6  ;;  %612 = vrot.lane.b32.xlu0 %v2799_v0, %s2733_s6 }
  0x6e   : > { %618 = vrot.lane.b32.xlu1 %v2815_v4, %s2733_s6  ;;  %616 = vrot.lane.b32.xlu0 %v2818_v5, %s2733_s6 }
  0x72   : > { %622 = vrot.lane.b32.xlu1 %v2823_v6, %s2733_s6  ;;  %620 = vrot.lane.b32.xlu0 %v2826_v7, %s2733_s6 }
  0x76   : > { %550 = vrot.lane.b32.xlu1 %v2810_v3, %s2734_s7  ;;  %548 = vrot.lane.b32.xlu0 %v2802_v1, %s2734_s7 }
  0x7a   : > { %554 = vrot.lane.b32.xlu1 %v2807_v2, %s2734_s7  ;;  %552 = vrot.lane.b32.xlu0 %v2799_v0, %s2734_s7 }
  0x7e   : > { %558 = vrot.lane.b32.xlu1 %v2815_v4, %s2734_s7  ;;  %556 = vrot.lane.b32.xlu0 %v2818_v5, %s2734_s7 }
  0x82   : > { %562 = vrot.lane.b32.xlu1 %v2823_v6, %s2734_s7  ;;  %560 = vrot.lane.b32.xlu0 %v2826_v7, %s2734_s7  ;;  %s2747_s7 = smov 94  }
  0x84   : > { %v2882_v8 = vpop.permute.xlu1 %247  ;;  %v2884_v9 = vpop.permute.xlu0 %243 }
  0x86   : > { %486 = vrot.lane.b32.xlu1 %v2810_v3, %s2735_s8  ;;  %484 = vrot.lane.b32.xlu0 %v2802_v1, %s2735_s8 }
  0x88   : > { %v2888_v10 = vpop.permute.xlu1 %249  ;;  %v2890_v11 = vpop.permute.xlu0 %245 }
  0x8a   : > { %490 = vrot.lane.b32.xlu1 %v2807_v2, %s2735_s8  ;;  %488 = vrot.lane.b32.xlu0 %v2799_v0, %s2735_s8 }
  0x8c   : > { %v2896_v13 = vpop.permute.xlu1 %253  ;;  %v2898_v14 = vpop.permute.xlu0 %251 }
  0x8e   : > { %494 = vrot.lane.b32.xlu1 %v2815_v4, %s2735_s8  ;;  %492 = vrot.lane.b32.xlu0 %v2818_v5, %s2735_s8 }
  0x90   : > { %v2904_v15 = vpop.permute.xlu1 %257  ;;  %v2906_v16 = vpop.permute.xlu0 %255 }
  0x92   : > { %498 = vrot.lane.b32.xlu1 %v2823_v6, %s2735_s8  ;;  %496 = vrot.lane.b32.xlu0 %v2826_v7, %s2735_s8 }
  0x94   : > { %v2910_v17 = vpop.permute.xlu1 %306  ;;  %v2912_v18 = vpop.permute.xlu0 %304 }
  0x96   : > { %426 = vrot.lane.b32.xlu1 %v2810_v3, %s2737_s9  ;;  %424 = vrot.lane.b32.xlu0 %v2802_v1, %s2737_s9 }
  0x98   : > { %v2916_v19 = vpop.permute.xlu1 %310  ;;  %v2918_v20 = vpop.permute.xlu0 %308 }
  0x9a   : > { %430 = vrot.lane.b32.xlu1 %v2807_v2, %s2737_s9  ;;  %428 = vrot.lane.b32.xlu0 %v2799_v0, %s2737_s9 }
  0x9c   : > { %v2922_v21 = vpop.permute.xlu1 %314  ;;  %v2924_v22 = vpop.permute.xlu0 %312 }
  0x9e   : > { %434 = vrot.lane.b32.xlu1 %v2815_v4, %s2737_s9  ;;  %432 = vrot.lane.b32.xlu0 %v2818_v5, %s2737_s9 }
  0xa0   : > { %v2928_v24 = vpop.permute.xlu1 %318  ;;  %v2930_v25 = vpop.permute.xlu0 %316 }
  0xa2   : > { %438 = vrot.lane.b32.xlu1 %v2823_v6, %s2737_s9  ;;  %436 = vrot.lane.b32.xlu0 %v2826_v7, %s2737_s9  ;;  %s2743_s9 = smov 111  }
  0xa4   : > { %v2934_v27 = vpop.permute.xlu1 %366  ;;  %v2936_v28 = vpop.permute.xlu0 %364 }
  0xa6   : > { %370 = vrot.lane.b32.xlu1 %v2807_v2, %s2729_s27  ;;  %368 = vrot.lane.b32.xlu0 %v2799_v0, %s2729_s27 }
  0xa8   : > { %v791_v32 = vpop.permute.xlu1 %790  ;;  %v789_v33 = vpop.permute.xlu0 %788 }
  0xaa   : > { %374 = vrot.lane.b32.xlu1 %v2815_v4, %s2729_s27  ;;  %372 = vrot.lane.b32.xlu0 %v2818_v5, %s2729_s27 }
  0xac   : > { %v795_v35 = vpop.permute.xlu1 %794  ;;  %v793_v36 = vpop.permute.xlu0 %792 }
  0xad   : > { %v809_v37 = vsel %vm804_vm0, %v789_v33, %v793_v36  ;;  %v810_v38 = vsel %vm804_vm0, %v791_v32, %v795_v35 }
  0xae   : > { %378 = vrot.lane.b32.xlu1 %v2823_v6, %s2729_s27  ;;  %v837_v40 = vmul.f32 %v823_v34, %v809_v37  ;;  %v841_v41 = vmul.f32 %v823_v34, %v810_v38  ;;  %376 = vrot.lane.b32.xlu0 %v2826_v7, %s2729_s27  ;;  %s2742_s27 = smov 110  }
  0xb0   : > { %v799_v44 = vpop.permute.xlu1 %798  ;;  %v797_v45 = vpop.permute.xlu0 %796  ;;  %v845_v46 = vpack.c.bf16 %v841_v41, %v837_v40 }
  0xb1   : > { %v808_v48 = vsel %vm804_vm0, %v795_v35, %v799_v44  ;;  %v807_v49 = vsel %vm804_vm0, %v793_v36, %v797_v45  ;;  %v763_v35 = vrot.slane %v2584_v23, %v2947_v31 }
  0xb2   : > { %1288 = vrot.lane.b32.xlu1 %v2807_v2, %s2738_s12  ;;  %876 = vmatprep.subr.bf16.mxu0 %v845_v46  ;;  %v838_v54 = vmul.f32 %v827_v47, %v807_v49  ;;  %v842_v55 = vmul.f32 %v827_v47, %v808_v48 }
  0xb3   : > { %1286 = vrot.lane.b32.xlu0 %v2799_v0, %s2738_s12 }
  0xb4   : > { %v803_v52 = vpop.permute.xlu1 %802  ;;  %v801_v53 = vpop.permute.xlu0 %800  ;;  %v846_v34 = vpack.c.bf16 %v842_v55, %v838_v54 }
  0xb5   : > { %v812_v56 = vsel %vm804_vm0, %v803_v52, %v791_v32  ;;  %v811_v57 = vsel %vm804_vm0, %v801_v53, %v789_v33  ;;  %v805_v58 = vsel %vm804_vm0, %v797_v45, %v801_v53  ;;  %v806_v59 = vsel %vm804_vm0, %v799_v44, %v803_v52 }
  0xb6   : > { %1292 = vrot.lane.b32.xlu1 %v2815_v4, %s2738_s12  ;;  %v836_v60 = vmul.f32 %v819_v50, %v811_v57  ;;  %v840_v61 = vmul.f32 %v819_v50, %v812_v56  ;;  %v839_v62 = vmul.f32 %v831_v51, %v805_v58  ;;  %v843_v63 = vmul.f32 %v831_v51, %v806_v59 }
  0xb7   : > { %1290 = vrot.lane.b32.xlu0 %v2818_v5, %s2738_s12  ;;  %v767_v45 = vrot.slane %v2584_v23, %v2959_v39  ;;  %v759_v51 = vrot.slane %v2584_v23, %v2965_v42  ;;  %v771_v52 = vrot.slane %v2584_v23, %v2967_v43  ;;  %vm1681_vm0 = vcmp.lt.s32.totalorder %v2945_v30, 111 }
  0xb8   : > { %v731_v26 = vpop.permute.xlu1 %730  ;;  %v729_v29 = vpop.permute.xlu0 %728  ;;  %v844_v32 = vpack.c.bf16 %v840_v61, %v836_v60  ;;  %v847_v33 = vpack.c.bf16 %v843_v63, %v839_v62 }
  0xba   : > { %1284 = vrot.lane.b32.xlu1 %v2810_v3, %s2738_s12  ;;  %877 = vmatpush1.bf16.msra.mxu0 %v844_v32 }
  0xbb   : > { %1282 = vrot.lane.b32.xlu0 %v2802_v1, %s2738_s12  ;;  %929 = vmatprep.subr.bf16.mxu1 %v847_v33 }
  0xbc   : > { %930 = vmatpush1.bf16.msra.mxu1 %v846_v34  ;;  %v735_v36 = vpop.permute.xlu1 %734  ;;  %v733_v37 = vpop.permute.xlu0 %732 }
  0xbd   : > { %v750_v38 = vsel %vm744_vm1, %v731_v26, %v735_v36  ;;  %v749_v40 = vsel %vm744_vm1, %v729_v29, %v733_v37 }
  0xbe   : > { %v781_v41 = vmul.f32 %v763_v35, %v750_v38  ;;  %v777_v44 = vmul.f32 %v763_v35, %v749_v40  ;;  %1296 = vrot.lane.b32.xlu1 %v2823_v6, %s2738_s12 }
  0xbf   : > { %1294 = vrot.lane.b32.xlu0 %v2826_v7, %s2738_s12 }
  0xc0   : > { %v739_v46 = vpop.permute.xlu1 %738  ;;  %v737_v47 = vpop.permute.xlu0 %736  ;;  %v785_v48 = vpack.c.bf16 %v781_v41, %v777_v44 }
  0xc1   : > { %v748_v49 = vsel %vm744_vm1, %v735_v36, %v739_v46  ;;  %v747_v50 = vsel %vm744_vm1, %v733_v37, %v737_v47 }
  0xc2   : > { %1228 = vrot.lane.b32.xlu1 %v2807_v2, %s2739_s15  ;;  %878 = vmatprep.subr.bf16.mxu0 %v785_v48  ;;  %v782_v53 = vmul.f32 %v767_v45, %v748_v49  ;;  %v778_v54 = vmul.f32 %v767_v45, %v747_v50 }
  0xc3   : > { %1226 = vrot.lane.b32.xlu0 %v2799_v0, %s2739_s15 }
  0xc4   : > { %v743_v55 = vpop.permute.xlu1 %742  ;;  %v741_v56 = vpop.permute.xlu0 %740 }
  0xc5   : > { %v746_v57 = vsel %vm744_vm1, %v739_v46, %v743_v55  ;;  %v752_v58 = vsel %vm744_vm1, %v743_v55, %v731_v26  ;;  %v745_v59 = vsel %vm744_vm1, %v737_v47, %v741_v56  ;;  %v751_v60 = vsel %vm744_vm1, %v741_v56, %v729_v29  ;;  %v2583_v26 = vld [vmem:[%s4076_s4 + $0x7] ss:$8 sm:$0xf] }
  0xc6   : > { %v780_v61 = vmul.f32 %v759_v51, %v752_v58  ;;  %v783_v62 = vmul.f32 %v771_v52, %v746_v57  ;;  %v776_v63 = vmul.f32 %v759_v51, %v751_v60  ;;  %v779_v23 = vmul.f32 %v771_v52, %v745_v59  ;;  %1232 = vrot.lane.b32.xlu1 %v2815_v4, %s2739_s15 }
  0xc7   : > { %1230 = vrot.lane.b32.xlu0 %v2818_v5, %s2739_s15  ;;  %v786_v29 = vpack.c.bf16 %v782_v53, %v778_v54  ;;  %v703_v36 = vrot.slane %v2583_v26, %v2947_v31  ;;  %v707_v46 = vrot.slane %v2583_v26, %v2959_v39  ;;  %v699_v52 = vrot.slane %v2583_v26, %v2965_v42 }
  0xc8   : > { %v671_v32 = vpop.permute.xlu1 %670  ;;  %v669_v33 = vpop.permute.xlu0 %668  ;;  %v784_v34 = vpack.c.bf16 %v780_v61, %v776_v63  ;;  %v787_v35 = vpack.c.bf16 %v783_v62, %v779_v23  ;;  %v711_v53 = vrot.slane %v2583_v26, %v2967_v43  ;;  %vm1621_vm1 = vcmp.lt.s32.totalorder %v2945_v30, 112 }
  0xca   : > { %1224 = vrot.lane.b32.xlu1 %v2810_v3, %s2739_s15  ;;  %879 = vmatpush1.bf16.msra.mxu0 %v784_v34 }
  0xcb   : > { %1222 = vrot.lane.b32.xlu0 %v2802_v1, %s2739_s15  ;;  %931 = vmatprep.subr.bf16.mxu1 %v787_v35 }
  0xcc   : > { %932 = vmatpush1.bf16.msra.mxu1 %v786_v29  ;;  %v675_v37 = vpop.permute.xlu1 %674  ;;  %v673_v38 = vpop.permute.xlu0 %672 }
  0xcd   : > { %v690_v40 = vsel %vm684_vm2, %v671_v32, %v675_v37  ;;  %v689_v41 = vsel %vm684_vm2, %v669_v33, %v673_v38 }
  0xce   : > { %v721_v44 = vmul.f32 %v703_v36, %v690_v40  ;;  %v717_v45 = vmul.f32 %v703_v36, %v689_v41  ;;  %1236 = vrot.lane.b32.xlu1 %v2823_v6, %s2739_s15 }
  0xcf   : > { %1234 = vrot.lane.b32.xlu0 %v2826_v7, %s2739_s15 }
  0xd0   : > { %v679_v47 = vpop.permute.xlu1 %678  ;;  %v677_v48 = vpop.permute.xlu0 %676  ;;  %v725_v49 = vpack.c.bf16 %v721_v44, %v717_v45 }
  0xd1   : > { %v688_v50 = vsel %vm684_vm2, %v675_v37, %v679_v47  ;;  %v687_v51 = vsel %vm684_vm2, %v673_v38, %v677_v48 }
  0xd2   : > { %1160 = vrot.lane.b32.xlu1 %v2810_v3, %s2740_s19  ;;  %880 = vmatprep.subr.bf16.mxu0 %v725_v49  ;;  %v722_v54 = vmul.f32 %v707_v46, %v688_v50  ;;  %v718_v55 = vmul.f32 %v707_v46, %v687_v51 }
  0xd3   : > { %1158 = vrot.lane.b32.xlu0 %v2802_v1, %s2740_s19 }
  0xd4   : > { %v683_v56 = vpop.permute.xlu1 %682  ;;  %v681_v57 = vpop.permute.xlu0 %680 }
  0xd5   : > { %v686_v58 = vsel %vm684_vm2, %v679_v47, %v683_v56  ;;  %v692_v59 = vsel %vm684_vm2, %v683_v56, %v671_v32  ;;  %v685_v60 = vsel %vm684_vm2, %v677_v48, %v681_v57  ;;  %v691_v61 = vsel %vm684_vm2, %v681_v57, %v669_v33  ;;  %v2582_v32 = vld [vmem:[%s4076_s4 + $0x6] ss:$8 sm:$0xf] }
  0xd6   : > { %v720_v62 = vmul.f32 %v699_v52, %v692_v59  ;;  %v723_v63 = vmul.f32 %v711_v53, %v686_v58  ;;  %v716_v23 = vmul.f32 %v699_v52, %v691_v61  ;;  %v719_v26 = vmul.f32 %v711_v53, %v685_v60  ;;  %1164 = vrot.lane.b32.xlu1 %v2807_v2, %s2740_s19 }
  0xd7   : > { %1162 = vrot.lane.b32.xlu0 %v2799_v0, %s2740_s19  ;;  %v726_v33 = vpack.c.bf16 %v722_v54, %v718_v55  ;;  %v643_v37 = vrot.slane %v2582_v32, %v2947_v31  ;;  %v647_v47 = vrot.slane %v2582_v32, %v2959_v39  ;;  %v639_v53 = vrot.slane %v2582_v32, %v2965_v42 }
  0xd8   : > { %v611_v34 = vpop.permute.xlu1 %610  ;;  %v609_v35 = vpop.permute.xlu0 %608  ;;  %v724_v29 = vpack.c.bf16 %v720_v62, %v716_v23  ;;  %v727_v36 = vpack.c.bf16 %v723_v63, %v719_v26  ;;  %v651_v54 = vrot.slane %v2582_v32, %v2967_v43  ;;  %vm1561_vm2 = vcmp.lt.s32.totalorder %v2945_v30, 113 }
  0xda   : > { %1168 = vrot.lane.b32.xlu1 %v2815_v4, %s2740_s19  ;;  %881 = vmatpush1.bf16.msra.mxu0 %v724_v29 }
  0xdb   : > { %1166 = vrot.lane.b32.xlu0 %v2818_v5, %s2740_s19  ;;  %933 = vmatprep.subr.bf16.mxu1 %v727_v36 }
  0xdc   : > { %934 = vmatpush1.bf16.msra.mxu1 %v726_v33  ;;  %v615_v38 = vpop.permute.xlu1 %614  ;;  %v613_v40 = vpop.permute.xlu0 %612 }
  0xdd   : > { %v630_v41 = vsel %vm624_vm3, %v611_v34, %v615_v38  ;;  %v629_v44 = vsel %vm624_vm3, %v609_v35, %v613_v40 }
  0xde   : > { %v661_v45 = vmul.f32 %v643_v37, %v630_v41  ;;  %v657_v46 = vmul.f32 %v643_v37, %v629_v44  ;;  %1172 = vrot.lane.b32.xlu1 %v2823_v6, %s2740_s19 }
  0xdf   : > { %1170 = vrot.lane.b32.xlu0 %v2826_v7, %s2740_s19 }
  0xe0   : > { %v619_v48 = vpop.permute.xlu1 %618  ;;  %v617_v49 = vpop.permute.xlu0 %616  ;;  %v665_v50 = vpack.c.bf16 %v661_v45, %v657_v46 }
  0xe1   : > { %v628_v51 = vsel %vm624_vm3, %v615_v38, %v619_v48  ;;  %v627_v52 = vsel %vm624_vm3, %v613_v40, %v617_v49 }
  0xe2   : > { %1100 = vrot.lane.b32.xlu1 %v2810_v3, %s2741_s23  ;;  %882 = vmatprep.subr.bf16.mxu0 %v665_v50  ;;  %v662_v55 = vmul.f32 %v647_v47, %v628_v51  ;;  %v658_v56 = vmul.f32 %v647_v47, %v627_v52 }
  0xe3   : > { %1098 = vrot.lane.b32.xlu0 %v2802_v1, %s2741_s23 }
  0xe4   : > { %v623_v57 = vpop.permute.xlu1 %622  ;;  %v621_v58 = vpop.permute.xlu0 %620 }
  0xe5   : > { %v626_v59 = vsel %vm624_vm3, %v619_v48, %v623_v57  ;;  %v632_v60 = vsel %vm624_vm3, %v623_v57, %v611_v34  ;;  %v625_v61 = vsel %vm624_vm3, %v617_v49, %v621_v58  ;;  %v631_v62 = vsel %vm624_vm3, %v621_v58, %v609_v35  ;;  %v2581_v34 = vld [vmem:[%s4076_s4 + $0x5] ss:$8 sm:$0xf] }
  0xe6   : > { %v660_v63 = vmul.f32 %v639_v53, %v632_v60  ;;  %v663_v23 = vmul.f32 %v651_v54, %v626_v59  ;;  %v656_v26 = vmul.f32 %v639_v53, %v631_v62  ;;  %v659_v32 = vmul.f32 %v651_v54, %v625_v61  ;;  %1104 = vrot.lane.b32.xlu1 %v2807_v2, %s2741_s23 }
  0xe7   : > { %1102 = vrot.lane.b32.xlu0 %v2799_v0, %s2741_s23  ;;  %v666_v35 = vpack.c.bf16 %v662_v55, %v658_v56  ;;  %v583_v38 = vrot.slane %v2581_v34, %v2947_v31  ;;  %v587_v48 = vrot.slane %v2581_v34, %v2959_v39  ;;  %v579_v54 = vrot.slane %v2581_v34, %v2965_v42 }
  0xe8   : > { %v551_v29 = vpop.permute.xlu1 %550  ;;  %v549_v36 = vpop.permute.xlu0 %548  ;;  %v664_v33 = vpack.c.bf16 %v660_v63, %v656_v26  ;;  %v667_v37 = vpack.c.bf16 %v663_v23, %v659_v32  ;;  %v591_v55 = vrot.slane %v2581_v34, %v2967_v43  ;;  %vm1501_vm3 = vcmp.lt.s32.totalorder %v2945_v30, 114 }
  0xea   : > { %1108 = vrot.lane.b32.xlu1 %v2815_v4, %s2741_s23  ;;  %883 = vmatpush1.bf16.msra.mxu0 %v664_v33 }
  0xeb   : > { %1106 = vrot.lane.b32.xlu0 %v2818_v5, %s2741_s23  ;;  %935 = vmatprep.subr.bf16.mxu1 %v667_v37 }
  0xec   : > { %936 = vmatpush1.bf16.msra.mxu1 %v666_v35  ;;  %v555_v40 = vpop.permute.xlu1 %554  ;;  %v553_v41 = vpop.permute.xlu0 %552 }
  0xed   : > { %v570_v44 = vsel %vm564_vm4, %v551_v29, %v555_v40  ;;  %v569_v45 = vsel %vm564_vm4, %v549_v36, %v553_v41 }
  0xee   : > { %v601_v46 = vmul.f32 %v583_v38, %v570_v44  ;;  %v597_v47 = vmul.f32 %v583_v38, %v569_v45  ;;  %1112 = vrot.lane.b32.xlu1 %v2823_v6, %s2741_s23 }
  0xef   : > { %1110 = vrot.lane.b32.xlu0 %v2826_v7, %s2741_s23 }
  0xf0   : > { %v559_v49 = vpop.permute.xlu1 %558  ;;  %v557_v50 = vpop.permute.xlu0 %556  ;;  %v605_v51 = vpack.c.bf16 %v601_v46, %v597_v47 }
  0xf1   : > { %v568_v52 = vsel %vm564_vm4, %v555_v40, %v559_v49  ;;  %v567_v53 = vsel %vm564_vm4, %v553_v41, %v557_v50 }
  0xf2   : > { %1731 = vrot.lane.b32.xlu1 %v2807_v2, %s2742_s27  ;;  %884 = vmatprep.subr.bf16.mxu0 %v605_v51  ;;  %v602_v56 = vmul.f32 %v587_v48, %v568_v52  ;;  %v598_v57 = vmul.f32 %v587_v48, %v567_v53 }
  0xf3   : > { %1729 = vrot.lane.b32.xlu0 %v2799_v0, %s2742_s27 }
  0xf4   : > { %v563_v58 = vpop.permute.xlu1 %562  ;;  %v561_v59 = vpop.permute.xlu0 %560  ;;  %v606_v40 = vpack.c.bf16 %v602_v56, %v598_v57 }
  0xf5   : > { %v566_v60 = vsel %vm564_vm4, %v559_v49, %v563_v58  ;;  %v572_v61 = vsel %vm564_vm4, %v563_v58, %v551_v29  ;;  %v565_v62 = vsel %vm564_vm4, %v557_v50, %v561_v59  ;;  %v571_v63 = vsel %vm564_vm4, %v561_v59, %v549_v36  ;;  %v2580_v29 = vld [vmem:[%s4076_s4 + $0x4] ss:$8 sm:$0xf] }
  0xf6   : > { %v600_v23 = vmul.f32 %v579_v54, %v572_v61  ;;  %v603_v26 = vmul.f32 %v591_v55, %v566_v60  ;;  %v596_v32 = vmul.f32 %v579_v54, %v571_v63  ;;  %v599_v34 = vmul.f32 %v591_v55, %v565_v62  ;;  %1735 = vrot.lane.b32.xlu1 %v2815_v4, %s2742_s27  ;;  %v2697_v36 = vld [vmem:[%s4073_s1 + $0x10] sm:$0xff]   ;;  %v2698_v54 = vld [vmem:[%s4073_s1 + $0x18] sm:$0xff]  }
  0xf7   : > { %1733 = vrot.lane.b32.xlu0 %v2818_v5, %s2742_s27  ;;  %v519_v41 = vrot.slane %v2580_v29, %v2947_v31  ;;  %v523_v53 = vrot.slane %v2580_v29, %v2959_v39  ;;  %v515_v56 = vrot.slane %v2580_v29, %v2965_v42  ;;  %v527_v57 = vrot.slane %v2580_v29, %v2967_v43 }
  0xf8   : > { %v487_v33 = vpop.permute.xlu1 %486  ;;  %v485_v37 = vpop.permute.xlu0 %484  ;;  %v604_v35 = vpack.c.bf16 %v600_v23, %v596_v32  ;;  %v607_v38 = vpack.c.bf16 %v603_v26, %v599_v34  ;;  %vm2184_vm4 = vcmp.lt.s32.totalorder %v2945_v30, 94 }
  0xfa   : > { %1727 = vrot.lane.b32.xlu1 %v2810_v3, %s2742_s27  ;;  %885 = vmatpush1.bf16.msra.mxu0 %v604_v35 }
  0xfb   : > { %1725 = vrot.lane.b32.xlu0 %v2802_v1, %s2742_s27  ;;  %937 = vmatprep.subr.bf16.mxu1 %v607_v38 }
  0xfc   : > { %938 = vmatpush1.bf16.msra.mxu1 %v606_v40  ;;  %v491_v44 = vpop.permute.xlu1 %490  ;;  %v489_v45 = vpop.permute.xlu0 %488 }
  0xfd   : > { %v506_v46 = vsel %vm500_vm5, %v487_v33, %v491_v44  ;;  %v505_v47 = vsel %vm500_vm5, %v485_v37, %v489_v45  ;;  %2592 = vmatmul.mubr.msk.bf16.vlgmr.msra.gmra.mxu0 %vm863_vm6, %v2697_v36 }
  0xfe   : > { %v537_v48 = vmul.f32 %v519_v41, %v506_v46  ;;  %v533_v49 = vmul.f32 %v519_v41, %v505_v47  ;;  %1739 = vrot.lane.b32.xlu1 %v2823_v6, %s2742_s27  ;;  %912 = vmatprep.mubr.bf16.mxu0 %v2736_v12 }
  0xff   : > { %1737 = vrot.lane.b32.xlu0 %v2826_v7, %s2742_s27  ;;  %2594 = vmatmul.mubr.msk.bf16.vlgmr.msra.gmra.mxu1 %vm863_vm6, %v2697_v36  ;;  %s2746_s27 = smov 114  }
 0x100   : > { %v495_v50 = vpop.permute.xlu1 %494  ;;  %v493_v51 = vpop.permute.xlu0 %492  ;;  %v541_v52 = vpack.c.bf16 %v537_v48, %v533_v49  ;;  %965 = vmatprep.mubr.bf16.mxu1 %v2736_v12 }
 0x101   : > { %v504_v55 = vsel %vm500_vm5, %v491_v44, %v495_v50  ;;  %v503_v58 = vsel %vm500_vm5, %v489_v45, %v493_v51 }
 0x102   : > { %1671 = vrot.lane.b32.xlu1 %v2807_v2, %s2743_s9  ;;  %998 = vmatprep.subr.bf16.mxu0 %v541_v52  ;;  %v538_v60 = vmul.f32 %v523_v53, %v504_v55  ;;  %v534_v29 = vmul.f32 %v523_v53, %v503_v58 }
 0x103   : > { %1669 = vrot.lane.b32.xlu0 %v2799_v0, %s2743_s9 }
 0x104   : > { %v499_v59 = vpop.permute.xlu1 %498  ;;  %v497_v63 = vpop.permute.xlu0 %496  ;;  %v542_v45 = vpack.c.bf16 %v538_v60, %v534_v29 }
 0x105   : > { %v502_v61 = vsel %vm500_vm5, %v495_v50, %v499_v59  ;;  %v508_v62 = vsel %vm500_vm5, %v499_v59, %v487_v33  ;;  %2593 = vmatmul.mubr.msk.bf16.gmra.mxu0 %vm863_vm6, %v2698_v54  ;;  %v501_v32 = vsel %vm500_vm5, %v493_v51, %v497_v63  ;;  %v507_v34 = vsel %vm500_vm5, %v497_v63, %v485_v37  ;;  %v2579_v33 = vld [vmem:[%s4076_s4 + $0x3] ss:$8 sm:$0xf]  ;;  %v270_v51 = vld [vmem:[%s4076_s4] ss:$8 sm:$0xf] }
 0x106   : > { %v536_v23 = vmul.f32 %v515_v56, %v508_v62  ;;  %v539_v26 = vmul.f32 %v527_v57, %v502_v61  ;;  %1675 = vrot.lane.b32.xlu1 %v2815_v4, %s2743_s9  ;;  %v532_v35 = vmul.f32 %v515_v56, %v507_v34  ;;  %v535_v38 = vmul.f32 %v527_v57, %v501_v32  ;;  %v3235_v59 = vld [vmem:[%s4076_s4 + $0x2] ss:$8 sm:$0xf] }
 0x107   : > { %1673 = vrot.lane.b32.xlu0 %v2818_v5, %s2743_s9  ;;  %2595 = vmatmul.mubr.msk.bf16.gmra.mxu1 %vm863_vm6, %v2698_v54  ;;  %v459_v44 = vrot.slane %v2579_v33, %v2947_v31  ;;  %v279_v56 = vrot.slane %v270_v51, %v2947_v31  ;;  %v455_v57 = vrot.slane %v2579_v33, %v2965_v42  ;;  %vm2124_vm5 = vcmp.lt.s32.totalorder %v2945_v30, 95 }
 0x108   : > { %v427_v36 = vpop.permute.xlu1 %426  ;;  %1024 = vmatprep.mubr.bf16.mxu0 %v2736_v12  ;;  %1077 = vmatprep.mubr.bf16.mxu1 %v2736_v12  ;;  %v540_v37 = vpack.c.bf16 %v536_v23, %v532_v35  ;;  %v425_v40 = vpop.permute.xlu0 %424  ;;  %v543_v41 = vpack.c.bf16 %v539_v26, %v535_v38  ;;  %v467_v58 = vrot.slane %v2579_v33, %v2967_v43 }
 0x109   : > { %v3238_v60 = vrot.slane %v270_v51, %v2959_v39  ;;  %v3241_v61 = vrot.slane %v270_v51, %v2965_v42  ;;  %v463_v62 = vrot.slane %v2579_v33, %v2959_v39  ;;  %v267_v63 = vsel %vm261_vm8, %v2890_v11, %v2888_v10 }
 0x10a   : > { %1667 = vrot.lane.b32.xlu1 %v2810_v3, %s2743_s9  ;;  %999 = vmatpush1.bf16.msra.mxu0 %v540_v37  ;;  %v399_v38 = vrot.slane %v3235_v59, %v2947_v31 }
 0x10b   : > { %1665 = vrot.lane.b32.xlu0 %v2802_v1, %s2743_s9  ;;  %1051 = vmatprep.subr.bf16.mxu1 %v543_v41 }
 0x10c   : > { %v431_v46 = vpop.permute.xlu1 %430  ;;  %1052 = vmatpush1.bf16.msra.mxu1 %v542_v45  ;;  %v429_v48 = vpop.permute.xlu0 %428 }
 0x10d   : > { %v446_v47 = vsel %vm440_vm7, %v427_v36, %v431_v46  ;;  %v445_v50 = vsel %vm440_vm7, %v425_v40, %v429_v48 }
 0x10e   : > { %v477_v49 = vmul.f32 %v459_v44, %v446_v47  ;;  %1679 = vrot.lane.b32.xlu1 %v2823_v6, %s2743_s9  ;;  %v473_v52 = vmul.f32 %v459_v44, %v445_v50 }
 0x10f   : > { %1677 = vrot.lane.b32.xlu0 %v2826_v7, %s2743_s9 }
 0x110   : > { %v435_v53 = vpop.permute.xlu1 %434  ;;  %v433_v54 = vpop.permute.xlu0 %432  ;;  %v481_v55 = vpack.c.bf16 %v477_v49, %v473_v52  ;;  %v3279_v49 = vrot.slane %v270_v51, %v2967_v43  ;;  %v265_v51 = vsel %vm261_vm8, %v2888_v10, %v2896_v13  ;;  %v326_v10 = vsel %vm320_vm10, %v2910_v17, %v2916_v19 }
 0x111   : > { %v444_v23 = vsel %vm440_vm7, %v431_v46, %v435_v53  ;;  %v443_v26 = vsel %vm440_vm7, %v429_v48, %v433_v54  ;;  %v3276_v48 = vmul.f32 %v279_v56, %v267_v63 }
 0x112   : > { %1611 = vrot.lane.b32.xlu1 %v2807_v2, %s2744_s14  ;;  %1000 = vmatprep.subr.bf16.mxu0 %v481_v55  ;;  %v266_v2 = vsel %vm261_vm8, %v2884_v9, %v2882_v8  ;;  %v478_v45 = vmul.f32 %v463_v62, %v444_v23  ;;  %v474_v46 = vmul.f32 %v463_v62, %v443_v26 }
 0x113   : > { %1609 = vrot.lane.b32.xlu0 %v2799_v0, %s2744_s14  ;;  %v2577_v0 = vld [vmem:[%s4076_s4 + $0x1] ss:$8 sm:$0xf]  ;;  %v3289_v55 = vmul.f32 %v279_v56, %v266_v2  ;;  %v325_v56 = vsel %vm320_vm10, %v2912_v18, %v2918_v20 }
 0x114   : > { %v439_v32 = vpop.permute.xlu1 %438  ;;  %v437_v35 = vpop.permute.xlu0 %436  ;;  %v339_v50 = vrot.slane %v2577_v0, %v2947_v31  ;;  %v3284_v52 = vrot.slane %v2577_v0, %v2959_v39  ;;  %v335_v62 = vrot.slane %v2577_v0, %v2965_v42  ;;  %v482_v63 = vpack.c.bf16 %v478_v45, %v474_v46 }
 0x115   : > { %v442_v34 = vsel %vm440_vm7, %v435_v53, %v439_v32  ;;  %v448_v29 = vsel %vm440_vm7, %v439_v32, %v427_v36  ;;  %v441_v41 = vsel %vm440_vm7, %v433_v54, %v437_v35  ;;  %v447_v44 = vsel %vm440_vm7, %v437_v35, %v425_v40 }
 0x116   : > { %v476_v33 = vmul.f32 %v455_v57, %v448_v29  ;;  %v479_v37 = vmul.f32 %v467_v58, %v442_v34  ;;  %1615 = vrot.lane.b32.xlu1 %v2815_v4, %s2744_s14  ;;  %v472_v36 = vmul.f32 %v455_v57, %v447_v44  ;;  %v475_v47 = vmul.f32 %v467_v58, %v441_v41 }
 0x117   : > { %1613 = vrot.lane.b32.xlu0 %v2818_v5, %s2744_s14  ;;  %v301_v26 = vpack.c.bf16 %v3276_v48, %v3289_v55  ;;  %v3321_v32 = vsel %vm261_vm8, %v2882_v8, %v2898_v14  ;;  %v263_v34 = vsel %vm261_vm8, %v2896_v13, %v2904_v15  ;;  %v269_v35 = vsel %vm261_vm8, %v2904_v15, %v2890_v11 }
 0x118   : > { %v371_v40 = vpop.permute.xlu1 %370  ;;  %v480_v4 = vpack.c.bf16 %v476_v33, %v472_v36  ;;  %v369_v54 = vpop.permute.xlu0 %368  ;;  %v483_v5 = vpack.c.bf16 %v479_v37, %v475_v47  ;;  %v395_v8 = vrot.slane %v3235_v59, %v2965_v42  ;;  %v407_v13 = vrot.slane %v3235_v59, %v2967_v43 }
 0x119   : > { %v386_v53 = vsel %vm380_vm9, %v2934_v27, %v371_v40  ;;  %v385_v58 = vsel %vm380_vm9, %v2936_v28, %v369_v54  ;;  %v357_v33 = vmul.f32 %v339_v50, %v326_v10  ;;  %v353_v37 = vmul.f32 %v339_v50, %v325_v56 }
 0x11a   : > { %v417_v57 = vmul.f32 %v399_v38, %v386_v53  ;;  %1607 = vrot.lane.b32.xlu1 %v2810_v3, %s2744_s14  ;;  %v413_v23 = vmul.f32 %v399_v38, %v385_v58  ;;  %1001 = vmatpush1.bf16.msra.mxu0 %v480_v4  ;;  %v347_v3 = vrot.slane %v2577_v0, %v2967_v43  ;;  %v3381_v53 = vld [vmem:[%s2796_s24 + $0x8] sm:$0xff]  ;;  %vm2064_vm7 = vcmp.lt.s32.totalorder %v2945_v30, 96 }
 0x11b   : > { %1605 = vrot.lane.b32.xlu0 %v2802_v1, %s2744_s14  ;;  %1053 = vmatprep.subr.bf16.mxu1 %v483_v5  ;;  %v3315_v1 = vmul.f32 %v3238_v60, %v265_v51  ;;  %v262_v38 = vsel %vm261_vm8, %v2898_v14, %v2906_v16  ;;  %v403_v41 = vrot.slane %v3235_v59, %v2959_v39 }
 0x11c   : > { %v375_v2 = vpop.permute.xlu1 %374  ;;  %1054 = vmatpush1.bf16.msra.mxu1 %v482_v63  ;;  %v373_v0 = vpop.permute.xlu0 %372  ;;  %v421_v29 = vpack.c.bf16 %v417_v57, %v413_v23  ;;  %v328_v11 = vsel %vm320_vm10, %v2928_v24, %v2910_v17  ;;  %v327_v44 = vsel %vm320_vm10, %v2930_v25, %v2912_v18  ;;  %v323_v5 = vsel %vm320_vm10, %v2918_v20, %v2924_v22 }
 0x11d   : > { %v384_v14 = vsel %vm380_vm9, %v371_v40, %v375_v2  ;;  %v383_v15 = vsel %vm380_vm9, %v369_v54, %v373_v0  ;;  %v3376_v40 = vld [vmem:[%s2796_s24 + $0x18] sm:$0xff]  ;;  %v324_v54 = vsel %vm320_vm10, %v2916_v19, %v2922_v21  ;;  %v356_v63 = vmul.f32 %v335_v62, %v328_v11  ;;  %v3401_v19 = vld [vmem:[%s2796_s24 + $0x30] sm:$0xff] }
 0x11e   : > { %1619 = vrot.lane.b32.xlu1 %v2823_v6, %s2744_s14  ;;  %1002 = vmatprep.subr.bf16.mxu0 %v421_v29  ;;  %v322_v6 = vsel %vm320_vm10, %v2922_v21, %v2928_v24  ;;  %v418_v18 = vmul.f32 %v403_v41, %v384_v14  ;;  %v352_v23 = vmul.f32 %v335_v62, %v327_v44  ;;  %v3410_v29 = vld [vmem:[%s2796_s24 + $0x20] sm:$0xff] }
 0x11f   : > { %1617 = vrot.lane.b32.xlu0 %v2826_v7, %s2744_s14  ;;  %v321_v7 = vsel %vm320_vm10, %v2924_v22, %v2930_v25  ;;  %v414_v25 = vmul.f32 %v403_v41, %v383_v15  ;;  %v359_v51 = vmul.f32 %v347_v3, %v322_v6  ;;  %v361_v20 = vpack.c.bf16 %v357_v33, %v353_v37  ;;  %v3431_v15 = vld [vmem:[%s2796_s24] sm:$0xff] }
 0x120   : > { %v379_v59 = vpop.permute.xlu1 %378  ;;  %v377_v45 = vpop.permute.xlu0 %376  ;;  %v355_v57 = vmul.f32 %v347_v3, %v321_v7  ;;  %v358_v22 = vmul.f32 %v3284_v52, %v324_v54  ;;  %v354_v62 = vmul.f32 %v3284_v52, %v323_v5  ;;  %v296_v33 = vmul.f32 %v3241_v61, %v269_v35 }
 0x121   : > { %v382_v17 = vsel %vm380_vm9, %v375_v2, %v379_v59  ;;  %v388_v24 = vsel %vm380_vm9, %v379_v59, %v2934_v27  ;;  %v381_v47 = vsel %vm380_vm9, %v373_v0, %v377_v45  ;;  %v387_v50 = vsel %vm380_vm9, %v377_v45, %v2936_v28  ;;  %v2605_v28 = vld [vmem:[%s4076_s4 + $0x26] ss:$8 sm:$0xf] }
 0x122   : > { %v416_v46 = vmul.f32 %v395_v8, %v388_v24  ;;  %v419_v36 = vmul.f32 %v407_v13, %v382_v17  ;;  %1551 = vrot.lane.b32.xlu1 %v3376_v40, %s2745_s21  ;;  %v412_v4 = vmul.f32 %v395_v8, %v387_v50  ;;  %v415_v27 = vmul.f32 %v407_v13, %v381_v47  ;;  %v3451_v47 = vld [vmem:[%s2796_s24 + $0x28] sm:$0xff]  ;;  %v2699_v50 = vld [vmem:[%s4073_s1] sm:$0xff]  }
 0x123   : > { %1549 = vrot.lane.b32.xlu0 %v3381_v53, %s2745_s21  ;;  %v268_v0 = vsel %vm261_vm8, %v2906_v16, %v2884_v9  ;;  %v1317_v21 = vrot.slane %v2605_v28, %v2947_v31  ;;  %v422_v3 = vpack.c.bf16 %v418_v18, %v414_v25  ;;  %v299_v9 = vmul.f32 %v3279_v49, %v263_v34  ;;  %v3423_v34 = vld [vmem:[%s2796_s24 + $0x10] sm:$0xff] }
 0x124   : > { %v1289_v58 = vpop.permute.xlu1 %1288  ;;  %v420_v10 = vpack.c.bf16 %v416_v46, %v412_v4  ;;  %v423_v2 = vpack.c.bf16 %v419_v36, %v415_v27  ;;  %v295_v16 = vmul.f32 %v3279_v49, %v262_v38  ;;  %v363_v13 = vpack.c.bf16 %v359_v51, %v355_v57  ;;  %v3444_v36 = vld [vmem:[%s2796_s24 + $0x38] sm:$0xff] }
 0x125   : > { %v1287_v56 = vpop.permute.xlu0 %1286  ;;  %v292_v52 = vmul.f32 %v3241_v61, %v268_v0  ;;  %v360_v37 = vpack.c.bf16 %v356_v63, %v352_v23  ;;  %v1313_v35 = vrot.slane %v2605_v28, %v2965_v42  ;;  %v294_v61 = vmul.f32 %v3238_v60, %v3321_v32  ;;  %v2604_v63 = vld [vmem:[%s4076_s4 + $0x25] ss:$8 sm:$0xf] }
 0x126   : > { %1555 = vrot.lane.b32.xlu1 %v3401_v19, %s2745_s21  ;;  %1003 = vmatpush1.bf16.msra.mxu0 %v420_v10  ;;  %v362_v38 = vpack.c.bf16 %v358_v22, %v354_v62  ;;  %v303_v7 = vpack.c.bf16 %v299_v9, %v295_v16  ;;  %v1321_v24 = vrot.slane %v2605_v28, %v2959_v39  ;;  %vm2004_vm8 = vcmp.lt.s32.totalorder %v2945_v30, 97 }
 0x127   : > { %1553 = vrot.lane.b32.xlu0 %v3410_v29, %s2745_s21  ;;  %1055 = vmatprep.subr.bf16.mxu1 %v423_v2  ;;  %v300_v44 = vpack.c.bf16 %v296_v33, %v292_v52  ;;  %v1325_v48 = vrot.slane %v2605_v28, %v2967_v43  ;;  %v302_v55 = vpack.c.bf16 %v3315_v1, %v294_v61  ;;  %vm1944_vm9 = vcmp.lt.s32.totalorder %v2945_v30, 98  ;;  %v2706_v30 = vld [vmem:[%s4073_s1 + $0x48] sm:$0xff]  }
 0x128   : > { %1004 = vmatprep.subr.bf16.mxu0 %v361_v20  ;;  %v1293_v8 = vpop.permute.xlu1 %1292  ;;  %1056 = vmatpush1.bf16.msra.mxu1 %v422_v3  ;;  %v1257_v0 = vrot.slane %v2604_v63, %v2947_v31  ;;  %v2700_v20 = vld [vmem:[%s4073_s1 + $0x8] sm:$0xff]   ;;  %v1253_v16 = vrot.slane %v2604_v63, %v2965_v42 }
 0x129   : > { %v1302_v41 = vsel %vm1298_vm11, %v1289_v58, %v1293_v8  ;;  %v1291_v6 = vpop.permute.xlu0 %1290  ;;  %1057 = vmatprep.subr.bf16.mxu1 %v363_v13 }
 0x12a   : > { %v1335_v11 = vmul.f32 %v1317_v21, %v1302_v41  ;;  %v1301_v49 = vsel %vm1298_vm11, %v1287_v56, %v1291_v6  ;;  %1547 = vrot.lane.b32.xlu1 %v3423_v34, %s2745_s21  ;;  %1005 = vmatpush1.bf16.msra.mxu0 %v360_v37 }
 0x12b   : > { %v1331_v14 = vmul.f32 %v1317_v21, %v1301_v49  ;;  %1545 = vrot.lane.b32.xlu0 %v3431_v15, %s2745_s21  ;;  %1006 = vmatprep.subr.bf16.mxu0 %v301_v26  ;;  %v1265_v49 = vrot.slane %v2604_v63, %v2967_v43 }
 0x12c   : > { %v1285_v59 = vpop.permute.xlu1 %1284  ;;  %1058 = vmatpush1.bf16.msra.mxu1 %v362_v38  ;;  %v1219_v38 = vpack.c.bf16 %v3376_v40, %v3381_v53 }
 0x12d   : > { %v1304_v60 = vsel %vm1298_vm11, %v1285_v59, %v1289_v58  ;;  %v1283_v32 = vpop.permute.xlu0 %1282  ;;  %v1339_v17 = vpack.c.bf16 %v1335_v11, %v1331_v14  ;;  %1059 = vmatprep.subr.bf16.mxu1 %v303_v7  ;;  %v1261_v11 = vrot.slane %v2604_v63, %v2959_v39 }
 0x12e   : > { %v1334_v45 = vmul.f32 %v1313_v35, %v1304_v60  ;;  %v1303_v46 = vsel %vm1298_vm11, %v1283_v32, %v1287_v56  ;;  %1559 = vrot.lane.b32.xlu1 %v3444_v36, %s2745_s21  ;;  %1007 = vmatpush1.bf16.msra.mxu0 %v300_v44 }
 0x12f   : > { %v1330_v26 = vmul.f32 %v1313_v35, %v1303_v46  ;;  %1557 = vrot.lane.b32.xlu0 %v3451_v47, %s2745_s21  ;;  %1369 = vmatprep.subr.bf16.mxu0 %v1339_v17 }
 0x130   : > { %v1297_v18 = vpop.permute.xlu1 %1296  ;;  %1060 = vmatpush1.bf16.msra.mxu1 %v302_v55 }
 0x131   : > { %v1338_v25 = vpack.c.bf16 %v1334_v45, %v1330_v26  ;;  %v1300_v4 = vsel %vm1298_vm11, %v1293_v8, %v1297_v18  ;;  %v1306_v1 = vsel %vm1298_vm11, %v1297_v18, %v1285_v59  ;;  %v1295_v27 = vpop.permute.xlu0 %1294  ;;  %2598 = vmatmul.mubr.msk.bf16.vlgmr.msra.gmra.mxu0 %vm863_vm6, %v2699_v50  ;;  %v1218_v26 = vpack.c.bf16 %v3423_v34, %v3431_v15 }
 0x132   : > { %v1336_v28 = vmul.f32 %v1321_v24, %v1300_v4  ;;  %v1337_v54 = vmul.f32 %v1325_v48, %v1306_v1  ;;  %v1299_v5 = vsel %vm1298_vm11, %v1291_v6, %v1295_v27  ;;  %v1305_v51 = vsel %vm1298_vm11, %v1295_v27, %v1283_v32  ;;  %1491 = vrot.lane.b32.xlu1 %v3376_v40, %s2746_s27 }
 0x133   : > { %v1332_v57 = vmul.f32 %v1321_v24, %v1299_v5  ;;  %v1333_v58 = vmul.f32 %v1325_v48, %v1305_v51  ;;  %1489 = vrot.lane.b32.xlu0 %v3381_v53, %s2746_s27  ;;  %1370 = vmatpush1.bf16.msra.mxu0 %v1338_v25  ;;  %v2603_v48 = vld [vmem:[%s4076_s4 + $0x23] ss:$8 sm:$0xf]  ;;  %v1221_v4 = vpack.c.bf16 %v3444_v36, %v3451_v47 }
 0x134   : > { %v1229_v23 = vpop.permute.xlu1 %1228  ;;  %2600 = vmatmul.mubr.msk.bf16.vlgmr.msra.gmra.mxu1 %vm863_vm6, %v2699_v50  ;;  %1034 = vmatprep.mubr.bf16.mxu0 %v2736_v12  ;;  %v1193_v1 = vrot.slane %v2603_v48, %v2947_v31 }
 0x135   : > { %v1340_v10 = vpack.c.bf16 %v1336_v28, %v1332_v57  ;;  %v1227_v56 = vpop.permute.xlu0 %1226  ;;  %v1341_v2 = vpack.c.bf16 %v1337_v54, %v1333_v58  ;;  %1087 = vmatprep.mubr.bf16.mxu1 %v2736_v12  ;;  %v1220_v28 = vpack.c.bf16 %v3401_v19, %v3410_v29 }
 0x136   : > { %1495 = vrot.lane.b32.xlu1 %v3401_v19, %s2746_s27 }
 0x137   : > { %1493 = vrot.lane.b32.xlu0 %v3410_v29, %s2746_s27  ;;  %1422 = vmatprep.subr.bf16.mxu1 %v1341_v2  ;;  %v1201_v2 = vrot.slane %v2603_v48, %v2967_v43 }
 0x138   : > { %1423 = vmatpush1.bf16.msra.mxu1 %v1340_v10  ;;  %v1233_v21 = vpop.permute.xlu1 %1232 }
 0x139   : > { %v1242_v22 = vsel %vm1238_vm12, %v1229_v23, %v1233_v21  ;;  %v1231_v62 = vpop.permute.xlu0 %1230  ;;  %2599 = vmatmul.mubr.msk.bf16.gmra.mxu0 %vm863_vm6, %v2700_v20 }
 0x13a   : > { %v1275_v3 = vmul.f32 %v1257_v0, %v1242_v22  ;;  %v1241_v9 = vsel %vm1238_vm12, %v1227_v56, %v1231_v62  ;;  %1487 = vrot.lane.b32.xlu1 %v3423_v34, %s2746_s27  ;;  %1395 = vmatprep.mubr.bf16.mxu0 %v2736_v12 }
 0x13b   : > { %v1271_v8 = vmul.f32 %v1257_v0, %v1241_v9  ;;  %1485 = vrot.lane.b32.xlu0 %v3431_v15, %s2746_s27  ;;  %v1197_v0 = vrot.slane %v2603_v48, %v2959_v39 }
 0x13c   : > { %v1225_v13 = vpop.permute.xlu1 %1224  ;;  %2601 = vmatmul.mubr.msk.bf16.gmra.mxu1 %vm863_vm6, %v2700_v20 }
 0x13d   : > { %v1244_v33 = vsel %vm1238_vm12, %v1225_v13, %v1229_v23  ;;  %v1223_v52 = vpop.permute.xlu0 %1222  ;;  %v1279_v37 = vpack.c.bf16 %v1275_v3, %v1271_v8  ;;  %1448 = vmatprep.mubr.bf16.mxu1 %v2736_v12 }
 0x13e   : > { %v1274_v41 = vmul.f32 %v1253_v16, %v1244_v33  ;;  %v1243_v6 = vsel %vm1238_vm12, %v1223_v52, %v1227_v56  ;;  %1499 = vrot.lane.b32.xlu1 %v3444_v36, %s2746_s27  ;;  %v1189_v56 = vrot.slane %v2603_v48, %v2965_v42 }
 0x13f   : > { %v1270_v35 = vmul.f32 %v1253_v16, %v1243_v6  ;;  %1497 = vrot.lane.b32.xlu0 %v3451_v47, %s2746_s27  ;;  %1371 = vmatprep.subr.bf16.mxu0 %v1279_v37 }
 0x140   : > { %v1237_v61 = vpop.permute.xlu1 %1236 }
 0x141   : > { %v1278_v14 = vpack.c.bf16 %v1274_v41, %v1270_v35  ;;  %v1240_v59 = vsel %vm1238_vm12, %v1233_v21, %v1237_v61  ;;  %v1246_v7 = vsel %vm1238_vm12, %v1237_v61, %v1225_v13  ;;  %v1235_v44 = vpop.permute.xlu0 %1234 }
 0x142   : > { %v1276_v60 = vmul.f32 %v1261_v11, %v1240_v59  ;;  %v1277_v32 = vmul.f32 %v1265_v49, %v1246_v7  ;;  %v1239_v17 = vsel %vm1238_vm12, %v1231_v62, %v1235_v44  ;;  %v1245_v24 = vsel %vm1238_vm12, %v1235_v44, %v1223_v52  ;;  %2174 = vrot.lane.b32.xlu1 %v3376_v40, %s2747_s7 }
 0x143   : > { %v1272_v45 = vmul.f32 %v1261_v11, %v1239_v17  ;;  %v1273_v46 = vmul.f32 %v1265_v49, %v1245_v24  ;;  %2172 = vrot.lane.b32.xlu0 %v3381_v53, %s2747_s7  ;;  %1372 = vmatpush1.bf16.msra.mxu0 %v1278_v14  ;;  %v2602_v11 = vld [vmem:[%s4076_s4 + $0x22] ss:$8 sm:$0xf] }
 0x144   : > { %v1161_v55 = vpop.permute.xlu1 %1160  ;;  %1373 = vmatprep.subr.bf16.mxu0 %v1219_v38  ;;  %v1133_v14 = vrot.slane %v2602_v11, %v2947_v31 }
 0x145   : > { %v1280_v50 = vpack.c.bf16 %v1276_v60, %v1272_v45  ;;  %v1159_v18 = vpop.permute.xlu0 %1158  ;;  %v1281_v25 = vpack.c.bf16 %v1277_v32, %v1273_v46 }
 0x146   : > { %2178 = vrot.lane.b32.xlu1 %v3401_v19, %s2747_s7 }
 0x147   : > { %2176 = vrot.lane.b32.xlu0 %v3410_v29, %s2747_s7  ;;  %1424 = vmatprep.subr.bf16.mxu1 %v1281_v25 }
 0x148   : > { %1425 = vmatpush1.bf16.msra.mxu1 %v1280_v50  ;;  %v1165_v27 = vpop.permute.xlu1 %1164  ;;  %1374 = vmatpush1.bf16.msra.mxu0 %v1218_v26  ;;  %v1141_v26 = vrot.slane %v2602_v11, %v2967_v43  ;;  %v1137_v50 = vrot.slane %v2602_v11, %v2959_v39 }
 0x149   : > { %v1180_v54 = vsel %vm1174_vm13, %v1161_v55, %v1165_v27  ;;  %v1163_v5 = vpop.permute.xlu0 %1162  ;;  %1426 = vmatprep.subr.bf16.mxu1 %v1221_v4 }
 0x14a   : > { %v1211_v51 = vmul.f32 %v1193_v1, %v1180_v54  ;;  %v1179_v57 = vsel %vm1174_vm13, %v1159_v18, %v1163_v5  ;;  %2170 = vrot.lane.b32.xlu1 %v3423_v34, %s2747_s7 }
 0x14b   : > { %v1207_v58 = vmul.f32 %v1193_v1, %v1179_v57  ;;  %2168 = vrot.lane.b32.xlu0 %v3431_v15, %s2747_s7 }
 0x14c   : > { %v1169_v63 = vpop.permute.xlu1 %1168  ;;  %1427 = vmatpush1.bf16.msra.mxu1 %v1220_v28 }
 0x14d   : > { %v1167_v23 = vpop.permute.xlu0 %1166  ;;  %v1215_v10 = vpack.c.bf16 %v1211_v51, %v1207_v58  ;;  %v1178_v20 = vsel %vm1174_vm13, %v1165_v27, %v1169_v63 }
 0x14e   : > { %2182 = vrot.lane.b32.xlu1 %v3444_v36, %s2747_s7  ;;  %v1177_v21 = vsel %vm1174_vm13, %v1163_v5, %v1167_v23  ;;  %v1212_v52 = vmul.f32 %v1197_v0, %v1178_v20 }
 0x14f   : > { %2180 = vrot.lane.b32.xlu0 %v3451_v47, %s2747_s7  ;;  %1375 = vmatprep.subr.bf16.mxu0 %v1215_v10  ;;  %v1208_v37 = vmul.f32 %v1197_v0, %v1177_v21 }
 0x150   : > { %v1173_v22 = vpop.permute.xlu1 %1172 }
 0x151   : > { %v1176_v62 = vsel %vm1174_vm13, %v1169_v63, %v1173_v22  ;;  %v1182_v3 = vsel %vm1174_vm13, %v1173_v22, %v1161_v55  ;;  %v1171_v9 = vpop.permute.xlu0 %1170  ;;  %v1216_v59 = vpack.c.bf16 %v1212_v52, %v1208_v37  ;;  %v1129_v55 = vrot.slane %v2602_v11, %v2965_v42 }
 0x152   : > { %v1210_v16 = vmul.f32 %v1189_v56, %v1182_v3  ;;  %v1213_v8 = vmul.f32 %v1201_v2, %v1176_v62  ;;  %v1175_v13 = vsel %vm1174_vm13, %v1167_v23, %v1171_v9  ;;  %v1181_v33 = vsel %vm1174_vm13, %v1171_v9, %v1159_v18  ;;  %2114 = vrot.lane.b32.xlu1 %v3376_v40, %s2748_s10  ;;  %v2701_v62 = vld [vmem:[%s4073_s1 + $0x20] sm:$0xff]  }
 0x153   : > { %v1206_v41 = vmul.f32 %v1189_v56, %v1181_v33  ;;  %v1209_v6 = vmul.f32 %v1201_v2, %v1175_v13  ;;  %2112 = vrot.lane.b32.xlu0 %v3381_v53, %s2748_s10  ;;  %v2620_v56 = vld [vmem:[%s4076_s4 + $0x43] ss:$8 sm:$0xf] }
 0x154   : > { %v1101_v49 = vpop.permute.xlu1 %1100  ;;  %v1760_v22 = vrot.slane %v2620_v56, %v2947_v31  ;;  %v1756_v52 = vrot.slane %v2620_v56, %v2965_v42 }
 0x155   : > { %v1214_v35 = vpack.c.bf16 %v1210_v16, %v1206_v41  ;;  %v1099_v61 = vpop.permute.xlu0 %1098  ;;  %v1217_v38 = vpack.c.bf16 %v1213_v8, %v1209_v6 }
 0x156   : > { %2118 = vrot.lane.b32.xlu1 %v3401_v19, %s2748_s10 }
 0x157   : > { %2116 = vrot.lane.b32.xlu0 %v3410_v29, %s2748_s10  ;;  %1376 = vmatpush1.bf16.msra.mxu0 %v1214_v35 }
 0x158   : > { %1428 = vmatprep.subr.bf16.mxu1 %v1217_v38  ;;  %v1105_v7 = vpop.permute.xlu1 %1104  ;;  %v1764_v38 = vrot.slane %v2620_v56, %v2959_v39 }
 0x159   : > { %1429 = vmatpush1.bf16.msra.mxu1 %v1216_v59  ;;  %v1120_v44 = vsel %vm1114_vm14, %v1101_v49, %v1105_v7  ;;  %v1103_v60 = vpop.permute.xlu0 %1102 }
 0x15a   : > { %v1151_v32 = vmul.f32 %v1133_v14, %v1120_v44  ;;  %v1119_v17 = vsel %vm1114_vm14, %v1099_v61, %v1103_v60  ;;  %2110 = vrot.lane.b32.xlu1 %v3423_v34, %s2748_s10  ;;  %v2702_v44 = vld [vmem:[%s4073_s1 + $0x28] sm:$0xff]  }
 0x15b   : > { %v1147_v24 = vmul.f32 %v1133_v14, %v1119_v17  ;;  %2108 = vrot.lane.b32.xlu0 %v3431_v15, %s2748_s10  ;;  %v1768_v14 = vrot.slane %v2620_v56, %v2967_v43 }
 0x15c   : > { %v1109_v45 = vpop.permute.xlu1 %1108 }
 0x15d   : > { %v1107_v46 = vpop.permute.xlu0 %1106  ;;  %v1155_v48 = vpack.c.bf16 %v1151_v32, %v1147_v24  ;;  %v1118_v18 = vsel %vm1114_vm14, %v1105_v7, %v1109_v45 }
 0x15e   : > { %2122 = vrot.lane.b32.xlu1 %v3444_v36, %s2748_s10  ;;  %v1117_v25 = vsel %vm1114_vm14, %v1103_v60, %v1107_v46  ;;  %v1152_v58 = vmul.f32 %v1137_v50, %v1118_v18  ;;  %v2619_v18 = vld [vmem:[%s4076_s4 + $0x42] ss:$8 sm:$0xf] }
 0x15f   : > { %2120 = vrot.lane.b32.xlu0 %v3451_v47, %s2748_s10  ;;  %1377 = vmatprep.subr.bf16.mxu0 %v1155_v48  ;;  %v1148_v63 = vmul.f32 %v1137_v50, %v1117_v25 }
 0x160   : > { %v1113_v4 = vpop.permute.xlu1 %1112 }
 0x161   : > { %v1116_v1 = vsel %vm1114_vm14, %v1109_v45, %v1113_v4  ;;  %v1122_v27 = vsel %vm1114_vm14, %v1113_v4, %v1101_v49  ;;  %v1111_v28 = vpop.permute.xlu0 %1110  ;;  %v1156_v3 = vpack.c.bf16 %v1152_v58, %v1148_v63  ;;  %v1696_v63 = vrot.slane %v2619_v18, %v2965_v42 }
 0x162   : > { %v1150_v54 = vmul.f32 %v1129_v55, %v1122_v27  ;;  %v1153_v5 = vmul.f32 %v1141_v26, %v1116_v1  ;;  %v1115_v51 = vsel %vm1114_vm14, %v1107_v46, %v1111_v28  ;;  %v1121_v57 = vsel %vm1114_vm14, %v1111_v28, %v1099_v61  ;;  %2054 = vrot.lane.b32.xlu1 %v3376_v40, %s2749_s13 }
 0x163   : > { %v1146_v23 = vmul.f32 %v1129_v55, %v1121_v57  ;;  %v1149_v10 = vmul.f32 %v1141_v26, %v1115_v51  ;;  %2052 = vrot.lane.b32.xlu0 %v3381_v53, %s2749_s13  ;;  %v1700_v28 = vrot.slane %v2619_v18, %v2947_v31 }
 0x164   : > { %v1732_v2 = vpop.permute.xlu1 %1731 }
 0x165   : > { %v1154_v0 = vpack.c.bf16 %v1150_v54, %v1146_v23  ;;  %v1730_v20 = vpop.permute.xlu0 %1729  ;;  %v1157_v21 = vpack.c.bf16 %v1153_v5, %v1149_v10 }
 0x166   : > { %2058 = vrot.lane.b32.xlu1 %v3401_v19, %s2749_s13 }
 0x167   : > { %2056 = vrot.lane.b32.xlu0 %v3410_v29, %s2749_s13  ;;  %1378 = vmatpush1.bf16.msra.mxu0 %v1154_v0 }
 0x168   : > { %1430 = vmatprep.subr.bf16.mxu1 %v1157_v21  ;;  %v1736_v9 = vpop.permute.xlu1 %1735 }
 0x169   : > { %1431 = vmatpush1.bf16.msra.mxu1 %v1156_v3  ;;  %v1745_v16 = vsel %vm1741_vm15, %v1732_v2, %v1736_v9  ;;  %v1734_v8 = vpop.permute.xlu0 %1733 }
 0x16a   : > { %v1778_v13 = vmul.f32 %v1760_v22, %v1745_v16  ;;  %v1744_v33 = vsel %vm1741_vm15, %v1730_v20, %v1734_v8  ;;  %2050 = vrot.lane.b32.xlu1 %v3423_v34, %s2749_s13  ;;  %2612 = vmatmul.mubr.msk.bf16.vlgmr.msra.gmra.mxu0 %vm863_vm6, %v2701_v62 }
 0x16b   : > { %v1774_v37 = vmul.f32 %v1760_v22, %v1744_v33  ;;  %2048 = vrot.lane.b32.xlu0 %v3431_v15, %s2749_s13  ;;  %1405 = vmatprep.mubr.bf16.mxu0 %v2736_v12  ;;  %v1704_v22 = vrot.slane %v2619_v18, %v2959_v39 }
 0x16c   : > { %v1728_v41 = vpop.permute.xlu1 %1727  ;;  %2614 = vmatmul.mubr.msk.bf16.vlgmr.msra.gmra.mxu1 %vm863_vm6, %v2701_v62  ;;  %v1708_v62 = vrot.slane %v2619_v18, %v2967_v43 }
 0x16d   : > { %v1747_v6 = vsel %vm1741_vm15, %v1728_v41, %v1732_v2  ;;  %v1726_v11 = vpop.permute.xlu0 %1725  ;;  %v1782_v49 = vpack.c.bf16 %v1778_v13, %v1774_v37  ;;  %1458 = vmatprep.mubr.bf16.mxu1 %v2736_v12 }
 0x16e   : > { %v1777_v35 = vmul.f32 %v1756_v52, %v1747_v6  ;;  %v1746_v61 = vsel %vm1741_vm15, %v1726_v11, %v1730_v20  ;;  %2062 = vrot.lane.b32.xlu1 %v3444_v36, %s2749_s13 }
 0x16f   : > { %v1773_v59 = vmul.f32 %v1756_v52, %v1746_v61  ;;  %2060 = vrot.lane.b32.xlu0 %v3451_v47, %s2749_s13  ;;  %1812 = vmatprep.subr.bf16.mxu0 %v1782_v49 }
 0x170   : > { %v1740_v7 = vpop.permute.xlu1 %1739 }
 0x171   : > { %v1781_v60 = vpack.c.bf16 %v1777_v35, %v1773_v59  ;;  %v1743_v32 = vsel %vm1741_vm15, %v1736_v9, %v1740_v7  ;;  %v1749_v17 = vsel %vm1741_vm15, %v1740_v7, %v1728_v41  ;;  %v1738_v24 = vpop.permute.xlu0 %1737  ;;  %v2618_v35 = vld [vmem:[%s4076_s4 + $0x41] ss:$8 sm:$0xf] }
 0x172   : > { %v1779_v45 = vmul.f32 %v1764_v38, %v1743_v32  ;;  %v1780_v46 = vmul.f32 %v1768_v14, %v1749_v17  ;;  %v1742_v48 = vsel %vm1741_vm15, %v1734_v8, %v1738_v24  ;;  %v1748_v55 = vsel %vm1741_vm15, %v1738_v24, %v1726_v11  ;;  %1994 = vrot.lane.b32.xlu1 %v3376_v40, %s2750_s22 }
 0x173   : > { %v1775_v26 = vmul.f32 %v1764_v38, %v1742_v48  ;;  %v1776_v50 = vmul.f32 %v1768_v14, %v1748_v55  ;;  %1992 = vrot.lane.b32.xlu0 %v3381_v53, %s2750_s22  ;;  %1813 = vmatpush1.bf16.msra.mxu0 %v1781_v60 }
 0x174   : > { %v1672_v25 = vpop.permute.xlu1 %1671  ;;  %2613 = vmatmul.mubr.msk.bf16.gmra.mxu0 %vm863_vm6, %v2702_v44  ;;  %2615 = vmatmul.mubr.msk.bf16.gmra.mxu1 %vm863_vm6, %v2702_v44 }
 0x175   : > { %v1783_v4 = vpack.c.bf16 %v1779_v45, %v1775_v26  ;;  %v1670_v1 = vpop.permute.xlu0 %1669  ;;  %v1784_v27 = vpack.c.bf16 %v1780_v46, %v1776_v50  ;;  %1838 = vmatprep.mubr.bf16.mxu0 %v2736_v12  ;;  %1891 = vmatprep.mubr.bf16.mxu1 %v2736_v12  ;;  %v1648_v26 = vrot.slane %v2618_v35, %v2967_v43 }
 0x176   : > { %1998 = vrot.lane.b32.xlu1 %v3401_v19, %s2750_s22 }
 0x177   : > { %1996 = vrot.lane.b32.xlu0 %v3410_v29, %s2750_s22  ;;  %1865 = vmatprep.subr.bf16.mxu1 %v1784_v27 }
 0x178   : > { %1866 = vmatpush1.bf16.msra.mxu1 %v1783_v4  ;;  %v1676_v54 = vpop.permute.xlu1 %1675 }
 0x179   : > { %v1685_v5 = vsel %vm1681_vm0, %v1672_v25, %v1676_v54  ;;  %v1674_v51 = vpop.permute.xlu0 %1673 }
 0x17a   : > { %v1718_v57 = vmul.f32 %v1700_v28, %v1685_v5  ;;  %v1684_v58 = vsel %vm1681_vm0, %v1670_v1, %v1674_v51  ;;  %1990 = vrot.lane.b32.xlu1 %v3423_v34, %s2750_s22 }
 0x17b   : > { %v1714_v23 = vmul.f32 %v1700_v28, %v1684_v58  ;;  %1988 = vrot.lane.b32.xlu0 %v3431_v15, %s2750_s22  ;;  %v2371_v58 = vld [vmem:[%s4074_s2] sm:$0xff] }
 0x17c   : > { %v1668_v10 = vpop.permute.xlu1 %1667 }
 0x17d   : > { %v1687_v56 = vsel %vm1681_vm0, %v1668_v10, %v1672_v25  ;;  %v1666_v2 = vpop.permute.xlu0 %1665  ;;  %v1722_v0 = vpack.c.bf16 %v1718_v57, %v1714_v23  ;;  %v2372_v57 = vld [vmem:[%s4074_s2 + $0x8] sm:$0xff] }
 0x17e   : > { %v1717_v20 = vmul.f32 %v1696_v63, %v1687_v56  ;;  %v1686_v21 = vsel %vm1681_vm0, %v1666_v2, %v1670_v1  ;;  %2002 = vrot.lane.b32.xlu1 %v3444_v36, %s2750_s22 }
 0x17f   : > { %v1713_v3 = vmul.f32 %v1696_v63, %v1686_v21  ;;  %2000 = vrot.lane.b32.xlu0 %v3451_v47, %s2750_s22  ;;  %1814 = vmatprep.subr.bf16.mxu0 %v1722_v0  ;;  %s2661_s22 = sshll.u32 %s4098_s20, 6 }
 0x180   : > { %v1680_v9 = vpop.permute.xlu1 %1679  ;;  %s4020_s25 = scalar_lea.vmem %s4077_s5, %s2661_s22 }
 0x181   : > { %v1721_v16 = vpack.c.bf16 %v1717_v20, %v1713_v3  ;;  %v1683_v8 = vsel %vm1681_vm0, %v1676_v54, %v1680_v9  ;;  %v1689_v13 = vsel %vm1681_vm0, %v1680_v9, %v1668_v10  ;;  %v1678_v33 = vpop.permute.xlu0 %1677  ;;  %v2374_v20 = vld [vmem:[%s4074_s2 + $0x18] sm:$0xff]  ;;  %v2375_v3 = vld [vmem:[%s4075_s3] sm:$0xff] }
 0x182   : > { %v1719_v52 = vmul.f32 %v1704_v22, %v1683_v8  ;;  %v1720_v37 = vmul.f32 %v1708_v62, %v1689_v13  ;;  %v1682_v41 = vsel %vm1681_vm0, %v1674_v51, %v1678_v33  ;;  %v1688_v6 = vsel %vm1681_vm0, %v1678_v33, %v1666_v2  ;;  %1934 = vrot.lane.b32.xlu1 %v3376_v40, %s2751_s26  ;;  %v2617_v51 = vld [vmem:[%s4076_s4 + $0x40] ss:$8 sm:$0xf] }
 0x183   : > { %v1715_v11 = vmul.f32 %v1704_v22, %v1682_v41  ;;  %v1716_v49 = vmul.f32 %v1708_v62, %v1688_v6  ;;  %1932 = vrot.lane.b32.xlu0 %v3381_v53, %s2751_s26  ;;  %1815 = vmatpush1.bf16.msra.mxu0 %v1721_v16  ;;  %v1640_v40 = vrot.slane %v2618_v35, %v2947_v31  ;;  %v2373_v2 = vld [vmem:[%s4074_s2 + $0x10] sm:$0xff]  ;;  %v2376_v13 = vld [vmem:[%s4075_s3 + $0x8] sm:$0xff] }
 0x184   : > { %v1612_v61 = vpop.permute.xlu1 %1611  ;;  %v1580_v0 = vrot.slane %v2617_v51, %v2947_v31  ;;  %v1576_v8 = vrot.slane %v2617_v51, %v2965_v42 }
 0x185   : > { %v1723_v38 = vpack.c.bf16 %v1719_v52, %v1715_v11  ;;  %v1610_v14 = vpop.permute.xlu0 %1609  ;;  %v1724_v59 = vpack.c.bf16 %v1720_v37, %v1716_v49  ;;  %v2377_v11 = vld [vmem:[%s4075_s3 + $0x10] sm:$0xff] }
 0x186   : > { %1938 = vrot.lane.b32.xlu1 %v3401_v19, %s2751_s26  ;;  %v1636_v19 = vrot.slane %v2618_v35, %v2965_v42 }
 0x187   : > { %1936 = vrot.lane.b32.xlu0 %v3410_v29, %s2751_s26  ;;  %1867 = vmatprep.subr.bf16.mxu1 %v1724_v59 }
 0x188   : > { %1868 = vmatpush1.bf16.msra.mxu1 %v1723_v38  ;;  %v1616_v53 = vpop.permute.xlu1 %1615  ;;  %v1588_v38 = vrot.slane %v2617_v51, %v2967_v43 }
 0x189   : > { %v1625_v7 = vsel %vm1621_vm1, %v1612_v61, %v1616_v53  ;;  %v1614_v44 = vpop.permute.xlu0 %1613 }
 0x18a   : > { %v1658_v60 = vmul.f32 %v1640_v40, %v1625_v7  ;;  %v1624_v32 = vsel %vm1621_vm1, %v1610_v14, %v1614_v44  ;;  %1930 = vrot.lane.b32.xlu1 %v3423_v34, %s2751_s26  ;;  %v1644_v34 = vrot.slane %v2618_v35, %v2959_v39 }
 0x18b   : > { %v1654_v17 = vmul.f32 %v1640_v40, %v1624_v32  ;;  %1928 = vrot.lane.b32.xlu0 %v3431_v15, %s2751_s26 }
 0x18c   : > { %v1608_v29 = vpop.permute.xlu1 %1607 }
 0x18d   : > { %v1627_v24 = vsel %vm1621_vm1, %v1608_v29, %v1612_v61  ;;  %v1606_v45 = vpop.permute.xlu0 %1605  ;;  %v1662_v46 = vpack.c.bf16 %v1658_v60, %v1654_v17  ;;  %v1584_v61 = vrot.slane %v2617_v51, %v2959_v39 }
 0x18e   : > { %v1657_v48 = vmul.f32 %v1636_v19, %v1627_v24  ;;  %v1626_v55 = vsel %vm1621_vm1, %v1606_v45, %v1610_v14  ;;  %1942 = vrot.lane.b32.xlu1 %v3444_v36, %s2751_s26  ;;  %v2378_v14 = vld [vmem:[%s4075_s3 + $0x18] sm:$0xff] }
 0x18f   : > { %v1653_v50 = vmul.f32 %v1636_v19, %v1626_v55  ;;  %1940 = vrot.lane.b32.xlu0 %v3451_v47, %s2751_s26  ;;  %1816 = vmatprep.subr.bf16.mxu0 %v1662_v46  ;;  %v2616_v46 = vld [vmem:[%s4076_s4 + $0x27] ss:$8 sm:$0xf] }
 0x190   : > { %v1620_v15 = vpop.permute.xlu1 %1619 }
 0x191   : > { %v1661_v18 = vpack.c.bf16 %v1657_v48, %v1653_v50  ;;  %v1623_v25 = vsel %vm1621_vm1, %v1616_v53, %v1620_v15  ;;  %v1629_v4 = vsel %vm1621_vm1, %v1620_v15, %v1608_v29  ;;  %v1618_v1 = vpop.permute.xlu0 %1617  ;;  %v1520_v50 = vrot.slane %v2616_v46, %v2947_v31 }
 0x192   : > { %v1659_v27 = vmul.f32 %v1644_v34, %v1623_v25  ;;  %v1660_v36 = vmul.f32 %v1648_v26, %v1629_v4  ;;  %v1622_v28 = vsel %vm1621_vm1, %v1614_v44, %v1618_v1  ;;  %v1628_v54 = vsel %vm1621_vm1, %v1618_v1, %v1606_v45  ;;  %2394 = vperm.xlu1 %2696, %v2372_v57  }
 0x193   : > { %v1655_v5 = vmul.f32 %v1644_v34, %v1622_v28  ;;  %v1656_v47 = vmul.f32 %v1648_v26, %v1628_v54  ;;  %1817 = vmatpush1.bf16.msra.mxu0 %v1661_v18  ;;  %2389 = vperm.xlu0 %2695, %v2371_v58   ;;  %v1524_v58 = vrot.slane %v2616_v46, %v2959_v39 }
 0x194   : > { %v1552_v63 = vpop.permute.xlu1 %1551 }
 0x195   : > { %v1663_v23 = vpack.c.bf16 %v1659_v27, %v1655_v5  ;;  %v1550_v10 = vpop.permute.xlu0 %1549  ;;  %v1664_v56 = vpack.c.bf16 %v1660_v36, %v1656_v47  ;;  %v1516_v27 = vrot.slane %v2616_v46, %v2965_v42 }
 0x196   : > { %2399 = vperm.xlu1 %2696, %v2373_v2  }
 0x197   : > { %1869 = vmatprep.subr.bf16.mxu1 %v1664_v56  ;;  %2404 = vperm.xlu0 %2695, %v2374_v20  }
 0x198   : > { %1870 = vmatpush1.bf16.msra.mxu1 %v1663_v23  ;;  %v1556_v21 = vpop.permute.xlu1 %1555 }
 0x199   : > { %v1565_v22 = vsel %vm1561_vm2, %v1552_v63, %v1556_v21  ;;  %v1554_v62 = vpop.permute.xlu0 %1553 }
 0x19a   : > { %v1598_v9 = vmul.f32 %v1580_v0, %v1565_v22  ;;  %v1564_v16 = vsel %vm1561_vm2, %v1550_v10, %v1554_v62  ;;  %2417 = vperm.xlu1 %2696, %v2375_v3  }
 0x19b   : > { %v1594_v33 = vmul.f32 %v1580_v0, %v1564_v16  ;;  %2422 = vperm.xlu0 %2695, %v2376_v13   ;;  %v2635_v13 = vld [vmem:[%s4076_s4 + $0x60] ss:$8 sm:$0xf] }
 0x19c   : > { %v1548_v52 = vpop.permute.xlu1 %1547 }
 0x19d   : > { %v1567_v37 = vsel %vm1561_vm2, %v1548_v52, %v1552_v63  ;;  %v1546_v41 = vpop.permute.xlu0 %1545  ;;  %v1602_v6 = vpack.c.bf16 %v1598_v9, %v1594_v33  ;;  %v1528_v63 = vrot.slane %v2616_v46, %v2967_v43  ;;  %v2703_v9 = vld [vmem:[%s4073_s1 + $0x30] sm:$0xff]  }
 0x19e   : > { %v1597_v49 = vmul.f32 %v1576_v8, %v1567_v37  ;;  %v1566_v35 = vsel %vm1561_vm2, %v1546_v41, %v1550_v10  ;;  %2427 = vperm.xlu1 %2696, %v2377_v11  }
 0x19f   : > { %v1593_v59 = vmul.f32 %v1576_v8, %v1566_v35  ;;  %1818 = vmatprep.subr.bf16.mxu0 %v1602_v6  ;;  %2432 = vperm.xlu0 %2695, %v2378_v14   ;;  %v2203_v6 = vrot.slane %v2635_v13, %v2947_v31  ;;  %v2199_v14 = vrot.slane %v2635_v13, %v2965_v42 }
 0x1a0   : > { %v1560_v40 = vpop.permute.xlu1 %1559 }
 0x1a1   : > { %v1601_v53 = vpack.c.bf16 %v1597_v49, %v1593_v59  ;;  %v1563_v7 = vsel %vm1561_vm2, %v1556_v21, %v1560_v40  ;;  %v1569_v44 = vsel %vm1561_vm2, %v1560_v40, %v1548_v52  ;;  %v1558_v60 = vpop.permute.xlu0 %1557  ;;  %v2704_v59 = vld [vmem:[%s4073_s1 + $0x38] sm:$0xff]  }
 0x1a2   : > { %v1599_v32 = vmul.f32 %v1584_v61, %v1563_v7  ;;  %v1600_v19 = vmul.f32 %v1588_v38, %v1569_v44  ;;  %v1562_v17 = vsel %vm1561_vm2, %v1554_v62, %v1558_v60  ;;  %v1568_v29 = vsel %vm1561_vm2, %v1558_v60, %v1546_v41 }
 0x1a3   : > { %v1595_v24 = vmul.f32 %v1584_v61, %v1562_v17  ;;  %v1596_v45 = vmul.f32 %v1588_v38, %v1568_v29  ;;  %1819 = vmatpush1.bf16.msra.mxu0 %v1601_v53  ;;  %v2207_v17 = vrot.slane %v2635_v13, %v2959_v39  ;;  %v2211_v29 = vrot.slane %v2635_v13, %v2967_v43 }
 0x1a4   : > { %v1492_v48 = vpop.permute.xlu1 %1491 }
 0x1a5   : > { %v1603_v55 = vpack.c.bf16 %v1599_v32, %v1595_v24  ;;  %v1490_v34 = vpop.permute.xlu0 %1489  ;;  %v1604_v26 = vpack.c.bf16 %v1600_v19, %v1596_v45 }
 0x1a7   : > { %1871 = vmatprep.subr.bf16.mxu1 %v1604_v26 }
 0x1a8   : > { %1872 = vmatpush1.bf16.msra.mxu1 %v1603_v55  ;;  %v1496_v15 = vpop.permute.xlu1 %1495 }
 0x1a9   : > { %v1505_v18 = vsel %vm1501_vm3, %v1492_v48, %v1496_v15  ;;  %v1494_v25 = vpop.permute.xlu0 %1493 }
 0x1aa   : > { %v1538_v4 = vmul.f32 %v1520_v50, %v1505_v18  ;;  %v1504_v1 = vsel %vm1501_vm3, %v1490_v34, %v1494_v25 }
 0x1ab   : > { %v1534_v36 = vmul.f32 %v1520_v50, %v1504_v1  ;;  %v2634_v1 = vld [vmem:[%s4076_s4 + $0x47] ss:$8 sm:$0xf] }
 0x1ac   : > { %v1488_v28 = vpop.permute.xlu1 %1487 }
 0x1ad   : > { %v1507_v54 = vsel %vm1501_vm3, %v1488_v28, %v1492_v48  ;;  %v1486_v5 = vpop.permute.xlu0 %1485  ;;  %v1542_v47 = vpack.c.bf16 %v1538_v4, %v1534_v36 }
 0x1ae   : > { %v1537_v51 = vmul.f32 %v1516_v27, %v1507_v54  ;;  %v1506_v57 = vsel %vm1501_vm3, %v1486_v5, %v1490_v34 }
 0x1af   : > { %v1533_v23 = vmul.f32 %v1516_v27, %v1506_v57  ;;  %1820 = vmatprep.subr.bf16.mxu0 %v1542_v47 }
 0x1b0   : > { %v1500_v10 = vpop.permute.xlu1 %1499 }
 0x1b1   : > { %v1541_v56 = vpack.c.bf16 %v1537_v51, %v1533_v23  ;;  %v1503_v2 = vsel %vm1501_vm3, %v1496_v15, %v1500_v10  ;;  %v1509_v0 = vsel %vm1501_vm3, %v1500_v10, %v1488_v28  ;;  %v1498_v20 = vpop.permute.xlu0 %1497  ;;  %v2139_v23 = vrot.slane %v2634_v1, %v2965_v42 }
 0x1b2   : > { %v1539_v21 = vmul.f32 %v1524_v58, %v1503_v2  ;;  %v1540_v22 = vmul.f32 %v1528_v63, %v1509_v0  ;;  %v1502_v62 = vsel %vm1501_vm3, %v1494_v25, %v1498_v20  ;;  %v1508_v3 = vsel %vm1501_vm3, %v1498_v20, %v1486_v5 }
 0x1b3   : > { %v1535_v16 = vmul.f32 %v1524_v58, %v1502_v62  ;;  %v1536_v8 = vmul.f32 %v1528_v63, %v1508_v3  ;;  %1821 = vmatpush1.bf16.msra.mxu0 %v1541_v56  ;;  %v2143_v5 = vrot.slane %v2634_v1, %v2947_v31  ;;  %v2147_v62 = vrot.slane %v2634_v1, %v2959_v39 }
 0x1b4   : > { %v2175_v33 = vpop.permute.xlu1 %2174  ;;  %v2151_v3 = vrot.slane %v2634_v1, %v2967_v43 }
 0x1b5   : > { %v1543_v52 = vpack.c.bf16 %v1539_v21, %v1535_v16  ;;  %v2173_v37 = vpop.permute.xlu0 %2172  ;;  %v1544_v41 = vpack.c.bf16 %v1540_v22, %v1536_v8 }
 0x1b6   : > { %2627 = vmatmul.mubr.msk.bf16.vlgmr.msra.gmra.mxu0 %vm863_vm6, %v2703_v9 }
 0x1b7   : > { %1873 = vmatprep.subr.bf16.mxu1 %v1544_v41  ;;  %1848 = vmatprep.mubr.bf16.mxu0 %v2736_v12 }
 0x1b8   : > { %1874 = vmatpush1.bf16.msra.mxu1 %v1543_v52  ;;  %v2179_v11 = vpop.permute.xlu1 %2178 }
 0x1b9   : > { %v2188_v49 = vsel %vm2184_vm4, %v2175_v33, %v2179_v11  ;;  %v2177_v35 = vpop.permute.xlu0 %2176 }
 0x1ba   : > { %v2221_v61 = vmul.f32 %v2203_v6, %v2188_v49  ;;  %v2187_v38 = vsel %vm2184_vm4, %v2173_v37, %v2177_v35 }
 0x1bb   : > { %v2217_v40 = vmul.f32 %v2203_v6, %v2187_v38  ;;  %2629 = vmatmul.mubr.msk.bf16.vlgmr.msra.gmra.mxu1 %vm863_vm6, %v2703_v9 }
 0x1bc   : > { %v2171_v53 = vpop.permute.xlu1 %2170  ;;  %1901 = vmatprep.mubr.bf16.mxu1 %v2736_v12 }
 0x1bd   : > { %v2190_v7 = vsel %vm2184_vm4, %v2171_v53, %v2175_v33  ;;  %v2169_v44 = vpop.permute.xlu0 %2168  ;;  %v2225_v60 = vpack.c.bf16 %v2221_v61, %v2217_v40  ;;  %v2633_v61 = vld [vmem:[%s4076_s4 + $0x46] ss:$8 sm:$0xf] }
 0x1be   : > { %v2220_v32 = vmul.f32 %v2199_v14, %v2190_v7  ;;  %v2189_v19 = vsel %vm2184_vm4, %v2169_v44, %v2173_v37  ;;  %2628 = vmatmul.mubr.msk.bf16.gmra.mxu0 %vm863_vm6, %v2704_v59 }
 0x1bf   : > { %v2216_v24 = vmul.f32 %v2199_v14, %v2189_v19  ;;  %2255 = vmatprep.subr.bf16.mxu0 %v2225_v60  ;;  %2281 = vmatprep.mubr.bf16.mxu0 %v2736_v12 }
 0x1c0   : > { %v2183_v45 = vpop.permute.xlu1 %2182 }
 0x1c1   : > { %v2224_v46 = vpack.c.bf16 %v2220_v32, %v2216_v24  ;;  %v2186_v48 = vsel %vm2184_vm4, %v2179_v11, %v2183_v45  ;;  %v2192_v55 = vsel %vm2184_vm4, %v2183_v45, %v2171_v53  ;;  %v2181_v34 = vpop.permute.xlu0 %2180  ;;  %v2083_v53 = vrot.slane %v2633_v61, %v2947_v31 }
 0x1c2   : > { %v2222_v26 = vmul.f32 %v2207_v17, %v2186_v48  ;;  %v2223_v50 = vmul.f32 %v2211_v29, %v2192_v55  ;;  %v2185_v15 = vsel %vm2184_vm4, %v2177_v35, %v2181_v34  ;;  %v2191_v18 = vsel %vm2184_vm4, %v2181_v34, %v2169_v44 }
 0x1c3   : > { %v2218_v25 = vmul.f32 %v2207_v17, %v2185_v15  ;;  %v2219_v4 = vmul.f32 %v2211_v29, %v2191_v18  ;;  %2256 = vmatpush1.bf16.msra.mxu0 %v2224_v46  ;;  %2630 = vmatmul.mubr.msk.bf16.gmra.mxu1 %vm863_vm6, %v2704_v59  ;;  %v2079_v17 = vrot.slane %v2633_v61, %v2965_v42 }
 0x1c4   : > { %v2115_v27 = vpop.permute.xlu1 %2114  ;;  %2334 = vmatprep.mubr.bf16.mxu1 %v2736_v12 }
 0x1c5   : > { %v2226_v36 = vpack.c.bf16 %v2222_v26, %v2218_v25  ;;  %v2113_v28 = vpop.permute.xlu0 %2112  ;;  %v2227_v54 = vpack.c.bf16 %v2223_v50, %v2219_v4  ;;  %v2087_v26 = vrot.slane %v2633_v61, %v2959_v39  ;;  %v2091_v50 = vrot.slane %v2633_v61, %v2967_v43 }
 0x1c7   : > { %2308 = vmatprep.subr.bf16.mxu1 %v2227_v54 }
 0x1c8   : > { %2309 = vmatpush1.bf16.msra.mxu1 %v2226_v36  ;;  %v2119_v47 = vpop.permute.xlu1 %2118 }
 0x1c9   : > { %v2128_v51 = vsel %vm2124_vm5, %v2115_v27, %v2119_v47  ;;  %v2117_v57 = vpop.permute.xlu0 %2116 }
 0x1ca   : > { %v2161_v58 = vmul.f32 %v2143_v5, %v2128_v51  ;;  %v2127_v63 = vsel %vm2124_vm5, %v2113_v28, %v2117_v57 }
 0x1cb   : > { %v2157_v10 = vmul.f32 %v2143_v5, %v2127_v63 }
 0x1cc   : > { %v2111_v56 = vpop.permute.xlu1 %2110 }
 0x1cd   : > { %v2130_v2 = vsel %vm2124_vm5, %v2111_v56, %v2115_v27  ;;  %v2109_v0 = vpop.permute.xlu0 %2108  ;;  %v2165_v20 = vpack.c.bf16 %v2161_v58, %v2157_v10 }
 0x1ce   : > { %v2160_v21 = vmul.f32 %v2139_v23, %v2130_v2  ;;  %v2129_v22 = vsel %vm2124_vm5, %v2109_v0, %v2113_v28 }
 0x1cf   : > { %v2156_v9 = vmul.f32 %v2139_v23, %v2129_v22  ;;  %2257 = vmatprep.subr.bf16.mxu0 %v2165_v20 }
 0x1d0   : > { %v2123_v16 = vpop.permute.xlu1 %2122 }
 0x1d1   : > { %v2164_v8 = vpack.c.bf16 %v2160_v21, %v2156_v9  ;;  %v2126_v13 = vsel %vm2124_vm5, %v2119_v47, %v2123_v16  ;;  %v2132_v33 = vsel %vm2124_vm5, %v2123_v16, %v2111_v56  ;;  %v2121_v52 = vpop.permute.xlu0 %2120 }
 0x1d2   : > { %v2162_v37 = vmul.f32 %v2147_v62, %v2126_v13  ;;  %v2163_v41 = vmul.f32 %v2151_v3, %v2132_v33  ;;  %v2125_v6 = vsel %vm2124_vm5, %v2117_v57, %v2121_v52  ;;  %v2131_v11 = vsel %vm2124_vm5, %v2121_v52, %v2109_v0  ;;  %v2632_v57 = vld [vmem:[%s4076_s4 + $0x45] ss:$8 sm:$0xf] }
 0x1d3   : > { %v2158_v49 = vmul.f32 %v2147_v62, %v2125_v6  ;;  %v2159_v35 = vmul.f32 %v2151_v3, %v2131_v11  ;;  %2258 = vmatpush1.bf16.msra.mxu0 %v2164_v8  ;;  %v2023_v56 = vrot.slane %v2632_v57, %v2947_v31  ;;  %v2019_v62 = vrot.slane %v2632_v57, %v2965_v42 }
 0x1d4   : > { %v2055_v38 = vpop.permute.xlu1 %2054 }
 0x1d5   : > { %v2166_v14 = vpack.c.bf16 %v2162_v37, %v2158_v49  ;;  %v2053_v59 = vpop.permute.xlu0 %2052  ;;  %v2167_v40 = vpack.c.bf16 %v2163_v41, %v2159_v35  ;;  %v2027_v37 = vrot.slane %v2632_v57, %v2959_v39  ;;  %v2031_v41 = vrot.slane %v2632_v57, %v2967_v43 }
 0x1d7   : > { %2310 = vmatprep.subr.bf16.mxu1 %v2167_v40 }
 0x1d8   : > { %2311 = vmatpush1.bf16.msra.mxu1 %v2166_v14  ;;  %v2059_v7 = vpop.permute.xlu1 %2058 }
 0x1d9   : > { %v2068_v44 = vsel %vm2064_vm7, %v2055_v38, %v2059_v7  ;;  %v2057_v60 = vpop.permute.xlu0 %2056 }
 0x1da   : > { %v2101_v32 = vmul.f32 %v2083_v53, %v2068_v44  ;;  %v2067_v19 = vsel %vm2064_vm7, %v2053_v59, %v2057_v60 }
 0x1db   : > { %v2097_v29 = vmul.f32 %v2083_v53, %v2067_v19 }
 0x1dc   : > { %v2051_v24 = vpop.permute.xlu1 %2050 }
 0x1dd   : > { %v2070_v45 = vsel %vm2064_vm7, %v2051_v24, %v2055_v38  ;;  %v2049_v46 = vpop.permute.xlu0 %2048  ;;  %v2105_v48 = vpack.c.bf16 %v2101_v32, %v2097_v29 }
 0x1de   : > { %v2100_v55 = vmul.f32 %v2079_v17, %v2070_v45  ;;  %v2069_v34 = vsel %vm2064_vm7, %v2049_v46, %v2053_v59 }
 0x1df   : > { %v2096_v15 = vmul.f32 %v2079_v17, %v2069_v34  ;;  %2259 = vmatprep.subr.bf16.mxu0 %v2105_v48 }
 0x1e0   : > { %v2063_v18 = vpop.permute.xlu1 %2062 }
 0x1e1   : > { %v2104_v25 = vpack.c.bf16 %v2100_v55, %v2096_v15  ;;  %v2066_v4 = vsel %vm2064_vm7, %v2059_v7, %v2063_v18  ;;  %v2072_v1 = vsel %vm2064_vm7, %v2063_v18, %v2051_v24  ;;  %v2061_v27 = vpop.permute.xlu0 %2060 }
 0x1e2   : > { %v2102_v36 = vmul.f32 %v2087_v26, %v2066_v4  ;;  %v2103_v28 = vmul.f32 %v2091_v50, %v2072_v1  ;;  %v2065_v54 = vsel %vm2064_vm7, %v2057_v60, %v2061_v27  ;;  %v2071_v5 = vsel %vm2064_vm7, %v2061_v27, %v2049_v46  ;;  %v2631_v60 = vld [vmem:[%s4076_s4 + $0x44] ss:$8 sm:$0xf] }
 0x1e3   : > { %v2098_v47 = vmul.f32 %v2087_v26, %v2065_v54  ;;  %v2099_v51 = vmul.f32 %v2091_v50, %v2071_v5  ;;  %2260 = vmatpush1.bf16.msra.mxu0 %v2104_v25  ;;  %v1963_v24 = vrot.slane %v2631_v60, %v2947_v31  ;;  %v1959_v26 = vrot.slane %v2631_v60, %v2965_v42 }
 0x1e4   : > { %v1995_v58 = vpop.permute.xlu1 %1994  ;;  %v1967_v27 = vrot.slane %v2631_v60, %v2959_v39 }
 0x1e5   : > { %v2106_v63 = vpack.c.bf16 %v2102_v36, %v2098_v47  ;;  %v1993_v23 = vpop.permute.xlu0 %1992  ;;  %v2107_v10 = vpack.c.bf16 %v2103_v28, %v2099_v51  ;;  %v1971_v36 = vrot.slane %v2631_v60, %v2967_v43  ;;  %v2705_v43 = vld [vmem:[%s4073_s1 + $0x40] sm:$0xff]  }
 0x1e7   : > { %2312 = vmatprep.subr.bf16.mxu1 %v2107_v10 }
 0x1e8   : > { %2313 = vmatpush1.bf16.msra.mxu1 %v2106_v63  ;;  %v1999_v2 = vpop.permute.xlu1 %1998 }
 0x1e9   : > { %v2008_v0 = vsel %vm2004_vm8, %v1995_v58, %v1999_v2  ;;  %v1997_v20 = vpop.permute.xlu0 %1996 }
 0x1ea   : > { %v2041_v21 = vmul.f32 %v2023_v56, %v2008_v0  ;;  %v2007_v22 = vsel %vm2004_vm8, %v1993_v23, %v1997_v20  ;;  %v904_v0 = vpop.f32.mrf.mxu0 }
 0x1eb   : > { %v2037_v3 = vmul.f32 %v2023_v56, %v2007_v22 }
 0x1ec   : > { %v1991_v9 = vpop.permute.xlu1 %1990 }
 0x1ed   : > { %v2010_v16 = vsel %vm2004_vm8, %v1991_v9, %v1995_v58  ;;  %v1989_v8 = vpop.permute.xlu0 %1988  ;;  %v2045_v13 = vpack.c.bf16 %v2041_v21, %v2037_v3  ;;  %v957_v21 = vpop.f32.mrf.mxu1 }
 0x1ee   : > { %v2040_v33 = vmul.f32 %v2019_v62, %v2010_v16  ;;  %v2009_v52 = vsel %vm2004_vm8, %v1989_v8, %v1993_v23 }
 0x1ef   : > { %v2036_v6 = vmul.f32 %v2019_v62, %v2009_v52  ;;  %2261 = vmatprep.subr.bf16.mxu0 %v2045_v13  ;;  %v959_v62 = vpop.f32.mrf.mxu1 }
 0x1f0   : > { %v2003_v11 = vpop.permute.xlu1 %2002 }
 0x1f1   : > { %v2044_v49 = vpack.c.bf16 %v2040_v33, %v2036_v6  ;;  %v2006_v35 = vsel %vm2004_vm8, %v1999_v2, %v2003_v11  ;;  %v2012_v61 = vsel %vm2004_vm8, %v2003_v11, %v1991_v9  ;;  %v2001_v38 = vpop.permute.xlu0 %2000  ;;  %v961_v9 = vpop.f32.mrf.mxu1 }
 0x1f2   : > { %v2042_v14 = vmul.f32 %v2027_v37, %v2006_v35  ;;  %v2043_v59 = vmul.f32 %v2031_v41, %v2012_v61  ;;  %v2005_v40 = vsel %vm2004_vm8, %v1997_v20, %v2001_v38  ;;  %v2011_v53 = vsel %vm2004_vm8, %v2001_v38, %v1989_v8  ;;  %v906_v20 = vpop.f32.mrf.mxu0 }
 0x1f3   : > { %v2038_v7 = vmul.f32 %v2027_v37, %v2005_v40  ;;  %v2039_v44 = vmul.f32 %v2031_v41, %v2011_v53  ;;  %2262 = vmatpush1.bf16.msra.mxu0 %v2044_v49  ;;  %v963_v8 = vpop.f32.mrf.mxu1 }
 0x1f4   : > { %v1935_v32 = vpop.permute.xlu1 %1934  ;;  %v908_v22 = vpop.f32.mrf.mxu0 }
 0x1f5   : > { %v2046_v19 = vpack.c.bf16 %v2042_v14, %v2038_v7  ;;  %v1933_v17 = vpop.permute.xlu0 %1932  ;;  %v2047_v29 = vpack.c.bf16 %v2043_v59, %v2039_v44  ;;  %v3961_v33 = vpop.f32.mrf.mxu1 }
 0x1f6   : > { %v910_v3 = vpop.f32.mrf.mxu0  ;;  %4081 = vst [vmem:[#allocation4_spill] sm:$0xff] %v3961_v33 }
 0x1f7   : > { %2314 = vmatprep.subr.bf16.mxu1 %v2047_v29 }
 0x1f8   : > { %2315 = vmatpush1.bf16.msra.mxu1 %v2046_v19  ;;  %v1939_v45 = vpop.permute.xlu1 %1938  ;;  %v3957_v16 = vpop.f32.mrf.mxu0 }
 0x1f9   : > { %v1948_v46 = vsel %vm1944_vm9, %v1935_v32, %v1939_v45  ;;  %v1937_v48 = vpop.permute.xlu0 %1936  ;;  %4079 = vst [vmem:[#allocation2_spill] sm:$0xff] %v3957_v16 }
 0x1fa   : > { %v1981_v55 = vmul.f32 %v1963_v24, %v1948_v46  ;;  %v1947_v34 = vsel %vm1944_vm9, %v1933_v17, %v1937_v48  ;;  %v3959_v13 = vpop.f32.mrf.mxu0 }
 0x1fb   : > { %v1977_v50 = vmul.f32 %v1963_v24, %v1947_v34  ;;  %4080 = vst [vmem:[#allocation3_spill] sm:$0xff] %v3959_v13 }
 0x1fc   : > { %v1931_v15 = vpop.permute.xlu1 %1930  ;;  %v3963_v52 = vpop.f32.mrf.mxu0 }
 0x1fd   : > { %v1950_v18 = vsel %vm1944_vm9, %v1931_v15, %v1935_v32  ;;  %v1929_v25 = vpop.permute.xlu0 %1928  ;;  %v1985_v31 = vpack.c.bf16 %v1981_v55, %v1977_v50  ;;  %4082 = vst [vmem:[#allocation5_spill] sm:$0xff] %v3963_v52 }
 0x1fe   : > { %v1980_v4 = vmul.f32 %v1959_v26, %v1950_v18  ;;  %v1949_v1 = vsel %vm1944_vm9, %v1929_v25, %v1933_v17  ;;  %v3965_v37 = vpop.f32.mrf.mxu0 }
 0x1ff   : > { %v1976_v28 = vmul.f32 %v1959_v26, %v1949_v1  ;;  %2263 = vmatprep.subr.bf16.mxu0 %v1985_v31  ;;  %4083 = vst [vmem:[#allocation6_spill] sm:$0xff] %v3965_v37 }
 0x200   : > { %v1943_v54 = vpop.permute.xlu1 %1942  ;;  %v1026_v6 = vpop.f32.mrf.mxu0 }
 0x201   : > { %v1984_v5 = vpack.c.bf16 %v1980_v4, %v1976_v28  ;;  %v1946_v42 = vsel %vm1944_vm9, %v1939_v45, %v1943_v54  ;;  %v1952_v47 = vsel %vm1944_vm9, %v1943_v54, %v1931_v15  ;;  %v1941_v51 = vpop.permute.xlu0 %1940 }
 0x202   : > { %v1982_v57 = vmul.f32 %v1967_v27, %v1946_v42  ;;  %v1983_v58 = vmul.f32 %v1971_v36, %v1952_v47  ;;  %v1945_v63 = vsel %vm1944_vm9, %v1937_v48, %v1941_v51  ;;  %v1951_v39 = vsel %vm1944_vm9, %v1941_v51, %v1929_v25  ;;  %v1028_v49 = vpop.f32.mrf.mxu0 }
 0x203   : > { %v1978_v23 = vmul.f32 %v1967_v27, %v1945_v63  ;;  %v1979_v10 = vmul.f32 %v1971_v36, %v1951_v39  ;;  %2264 = vmatpush1.bf16.msra.mxu0 %v1984_v5 }
 0x204   : > { %v1030_v61 = vpop.f32.mrf.mxu0 }
 0x205   : > { %v1986_v56 = vpack.c.bf16 %v1982_v57, %v1978_v23  ;;  %v1987_v2 = vpack.c.bf16 %v1983_v58, %v1979_v10 }
 0x206   : > { %2642 = vmatmul.mubr.msk.bf16.vlgmr.msra.gmra.mxu0 %vm863_vm6, %v2705_v43  ;;  %v1032_v14 = vpop.f32.mrf.mxu0 }
 0x207   : > { %2316 = vmatprep.subr.bf16.mxu1 %v1987_v2  ;;  %2291 = vmatprep.mubr.bf16.mxu0 %v2736_v12  ;;  %v1033_v37 = vadd.f32 %v1032_v14, %v910_v3 }
 0x208   : > { %2317 = vmatpush1.bf16.msra.mxu1 %v1986_v56  ;;  %v1036_v40 = vpop.f32.mrf.mxu0  ;;  %v1029_v56 = vadd.f32 %v1028_v49, %v906_v20  ;;  %v4090_v20 = vld [vmem:[#allocation4_spill] sm:$0xff] }
 0x20a   : > { %v1038_v7 = vpop.f32.mrf.mxu0 }
 0x20b   : > { %2644 = vmatmul.mubr.msk.bf16.vlgmr.msra.gmra.mxu1 %vm863_vm6, %v2705_v43  ;;  %v1027_v43 = vadd.f32 %v1026_v6, %v904_v0  ;;  %v4088_v0 = vld [vmem:[#allocation2_spill] sm:$0xff] }
 0x20c   : > { %2344 = vmatprep.mubr.bf16.mxu1 %v2736_v12  ;;  %v969_v12 = vpop.f32.mrf.mxu1  ;;  %v1040_v60 = vpop.f32.mrf.mxu0  ;;  %v1037_v6 = vadd.f32 %v1036_v40, %v4088_v0 }
 0x20d   : > { %v3973_v10 = vpop.permute.xlu1 %2394 }
 0x20e   : > { %2643 = vmatmul.mubr.msk.bf16.gmra.mxu0 %vm863_vm6, %v2706_v30  ;;  %v3967_v41 = vpop.f32.mrf.mxu1  ;;  %v1042_v19 = vpop.f32.mrf.mxu0  ;;  %4087 = vst [vmem:[#allocation10_spill] sm:$0xff] %v3973_v10 }
 0x20f   : > { %4084 = vst [vmem:[#allocation7_spill] sm:$0xff] %v3967_v41 }
 0x210   : > { %v3969_v11 = vpop.f32.mrf.mxu1 }
 0x211   : > { %4085 = vst [vmem:[#allocation8_spill] sm:$0xff] %v3969_v11  ;;  %v3984_v0 = vpop.permute.xlu1 %2399 }
 0x212   : > { %v1079_v35 = vpop.f32.mrf.mxu1 }
 0x213   : > { %2645 = vmatmul.mubr.msk.bf16.gmra.mxu1 %vm863_vm6, %v2706_v30  ;;  %v1080_v2 = vadd.f32 %v1079_v35, %v957_v21  ;;  %v1031_v30 = vadd.f32 %v1030_v61, %v908_v22  ;;  %v4091_v35 = vld [vmem:[#allocation5_spill] sm:$0xff]  ;;  %v4092_v61 = vld [vmem:[#allocation6_spill] sm:$0xff] }
 0x214   : > { %v1081_v38 = vpop.f32.mrf.mxu1  ;;  %v1041_v22 = vadd.f32 %v1040_v60, %v4091_v35 }
 0x215   : > { %v1082_v11 = vadd.f32 %v1081_v38, %v959_v62  ;;  %v1043_v38 = vadd.f32 %v1042_v19, %v4092_v61 }
 0x216   : > { %v1083_v59 = vpop.f32.mrf.mxu1  ;;  %v4093_v62 = vld [vmem:[#allocation7_spill] sm:$0xff] }
 0x217   : > { %v1084_v52 = vadd.f32 %v1083_v59, %v961_v9  ;;  %v3981_v9 = vpop.permute.xlu0 %2389 }
 0x218   : > { %v1085_v53 = vpop.f32.mrf.mxu1  ;;  %v4094_v59 = vld [vmem:[#allocation8_spill] sm:$0xff] }
 0x219   : > { %v1086_v33 = vadd.f32 %v1085_v53, %v963_v8 }
 0x21a   : > { %v1089_v44 = vpop.f32.mrf.mxu1 }
 0x21b   : > { %v1090_v49 = vadd.f32 %v1089_v44, %v4090_v20 }
 0x21c   : > { %v1091_v32 = vpop.f32.mrf.mxu1 }
 0x21d   : > { %v1092_v21 = vadd.f32 %v1091_v32, %v969_v12 }
 0x21e   : > { %v1093_v17 = vpop.f32.mrf.mxu1 }
 0x21f   : > { %v1094_v3 = vadd.f32 %v1093_v17, %v4093_v62 }
 0x220   : > { %v1095_v24 = vpop.f32.mrf.mxu1 }
 0x221   : > { %v1096_v8 = vadd.f32 %v1095_v24, %v4094_v59 }
 0x22a   : > { %v1397_v29 = vpop.f32.mrf.mxu0 }
 0x22b   : > { %v1469_v13 = vadd.f32 %v1397_v29, %v1027_v43 }
 0x22c   : > { %v1399_v45 = vpop.f32.mrf.mxu0  ;;  %v1450_v46 = vpop.f32.mrf.mxu1 }
 0x22d   : > { %v1470_v14 = vadd.f32 %v1399_v45, %v1029_v56  ;;  %v1471_v53 = vadd.f32 %v1450_v46, %v1080_v2 }
 0x22e   : > { %v1401_v48 = vpop.f32.mrf.mxu0  ;;  %v1452_v55 = vpop.f32.mrf.mxu1 }
 0x22f   : > { %v1473_v29 = vadd.f32 %v1401_v48, %v1031_v30  ;;  %v1472_v43 = vadd.f32 %v1452_v55, %v1082_v11 }
 0x230   : > { %v1403_v34 = vpop.f32.mrf.mxu0  ;;  %v1454_v26 = vpop.f32.mrf.mxu1 }
 0x231   : > { %v1475_v44 = vadd.f32 %v1454_v26, %v1084_v52 }
 0x232   : > { %v1456_v15 = vpop.f32.mrf.mxu1 }
 0x233   : > { %v1476_v12 = vadd.f32 %v1456_v15, %v1086_v33 }
 0x234   : > { %v1407_v50 = vpop.f32.mrf.mxu0  ;;  %v1460_v25 = vpop.f32.mrf.mxu1 }
 0x235   : > { %v1479_v17 = vadd.f32 %v1460_v25, %v1090_v49 }
 0x236   : > { %v1409_v18 = vpop.f32.mrf.mxu0  ;;  %v1462_v4 = vpop.f32.mrf.mxu1 }
 0x237   : > { %v1480_v45 = vadd.f32 %v1462_v4, %v1092_v21 }
 0x238   : > { %v1411_v31 = vpop.f32.mrf.mxu0  ;;  %v1464_v27 = vpop.f32.mrf.mxu1 }
 0x239   : > { %v1481_v20 = vadd.f32 %v1411_v31, %v1041_v22  ;;  %v1483_v35 = vadd.f32 %v1464_v27, %v1094_v3 }
 0x23a   : > { %v1413_v1 = vpop.f32.mrf.mxu0  ;;  %v1466_v28 = vpop.f32.mrf.mxu1 }
 0x23b   : > { %v1482_v48 = vadd.f32 %v1413_v1, %v1043_v38  ;;  %v1484_v11 = vadd.f32 %v1466_v28, %v1096_v8  ;;  %v2418_v1 = vpop.permute.xlu1 %2417  ;;  %v2716_v28 = vld [vmem:[%s2796_s24 + $0x8] sm:$0xff]  ;;  %v4096_v8 = vld [vmem:[#allocation10_spill] sm:$0xff] }
 0x23c   : > { %v4010_v38 = vld [vmem:[%s2796_s24 + $0x28] sm:$0xff] }
 0x276   : > { %v1840_v36 = vpop.f32.mrf.mxu0 }
 0x277   : > { %v1912_v32 = vadd.f32 %v1840_v36, %v1469_v13 }
 0x278   : > { %v1842_v54 = vpop.f32.mrf.mxu0 }
 0x279   : > { %v1913_v24 = vadd.f32 %v1842_v54, %v1470_v14 }
 0x27a   : > { %v1844_v42 = vpop.f32.mrf.mxu0 }
 0x27b   : > { %v1893_v5 = vpop.f32.mrf.mxu1  ;;  %v1916_v2 = vadd.f32 %v1844_v42, %v1473_v29 }
 0x27c   : > { %v1846_v51 = vpop.f32.mrf.mxu0  ;;  %v1914_v55 = vadd.f32 %v1893_v5, %v1471_v53 }
 0x27d   : > { %v1895_v47 = vpop.f32.mrf.mxu1 }
 0x27e   : > { %v1850_v58 = vpop.f32.mrf.mxu0  ;;  %v1915_v52 = vadd.f32 %v1895_v47, %v1472_v43  ;;  %v3994_v47 = vld [vmem:[%s2796_s24 + $0x20] sm:$0xff] }
 0x27f   : > { %v1897_v57 = vpop.f32.mrf.mxu1 }
 0x280   : > { %v1852_v39 = vpop.f32.mrf.mxu0  ;;  %v1918_v15 = vadd.f32 %v1897_v57, %v1475_v44 }
 0x281   : > { %v1899_v63 = vpop.f32.mrf.mxu1 }
 0x282   : > { %v1854_v41 = vpop.f32.mrf.mxu0 }
 0x283   : > { %v3971_v23 = vpop.f32.mrf.mxu1  ;;  %v3989_v27 = vadd.f32 %v1854_v41, %v1481_v20 }
 0x284   : > { %4086 = vst [vmem:[#allocation9_spill] sm:$0xff] %v3971_v23  ;;  %v4089_v23 = vld [vmem:[#allocation3_spill] sm:$0xff]  ;;  %v1856_v40 = vpop.f32.mrf.mxu0 }
 0x285   : > { %v1905_v16 = vpop.f32.mrf.mxu1  ;;  %v1039_v10 = vadd.f32 %v1038_v7, %v4089_v23  ;;  %v1474_v7 = vadd.f32 %v1403_v34, %v1033_v37  ;;  %v1477_v23 = vadd.f32 %v1407_v50, %v1037_v6  ;;  %v2715_v37 = vld [vmem:[%s2796_s24] sm:$0xff]  ;;  %v3987_v50 = vpop.permute.xlu0 %2404  ;;  %v4006_v6 = vld [vmem:[%s2796_s24 + $0x10] sm:$0xff] }
 0x287   : > { %v1907_v60 = vpop.f32.mrf.mxu1  ;;  %v1478_v19 = vadd.f32 %v1409_v18, %v1039_v10  ;;  %v1917_v33 = vadd.f32 %v1846_v51, %v1474_v7  ;;  %v1919_v18 = vadd.f32 %v1899_v63, %v1476_v12  ;;  %v1920_v25 = vadd.f32 %v1850_v58, %v1477_v23  ;;  %v4025_v12 = vld [vmem:[%s2796_s24 + $0x30] sm:$0xff] }
 0x288   : > { %v4000_v58 = vadd.f32 %v1905_v16, %v1480_v45  ;;  %v4002_v63 = vadd.f32 %v1856_v40, %v1482_v48  ;;  %v4012_v62 = vadd.f32 %v1907_v60, %v1483_v35  ;;  %v2718_v40 = vld [vmem:[%s2796_s24 + $0x18] sm:$0xff] }
 0x289   : > { %v1909_v13 = vpop.f32.mrf.mxu1  ;;  %v1921_v31 = vadd.f32 %v1852_v39, %v1478_v19  ;;  %v2423_v23 = vpop.permute.xlu0 %2422 }
 0x28a   : > { %v4014_v16 = vadd.f32 %v1909_v13, %v1484_v11 }
 0x28b   : > { %v4095_v51 = vld [vmem:[#allocation9_spill] sm:$0xff] }
 0x28c   : > { %v3998_v57 = vadd.f32 %v4095_v51, %v1479_v17 }
 0x2c6   : > { %v2283_v56 = vpop.f32.mrf.mxu0 }
 0x2c7   : > { %v2355_v46 = vadd.f32 %v2283_v56, %v1912_v32 }
 0x2c8   : > { %v2285_v30 = vpop.f32.mrf.mxu0 }
 0x2c9   : > { %v2379_v34 = vadd.f32 %v2715_v37, %v2355_v46  ;;  %v2356_v26 = vadd.f32 %v2285_v30, %v1913_v24  ;;  %v2649_v30 = vld [vmem:[%s2796_s24 + $0x38] sm:$0xff] }
 0x2ca   : > { %v2287_v4 = vpop.f32.mrf.mxu0 }
 0x2cb   : > { %v2407_v36 = vmul.f32 %v3981_v9, %v2379_v34  ;;  %v2380_v54 = vadd.f32 %v2716_v28, %v2356_v26  ;;  %v2359_v5 = vadd.f32 %v2287_v4, %v1916_v2  ;;  %v2336_v42 = vpop.f32.mrf.mxu1 }
 0x2cc   : > { %v2357_v39 = vadd.f32 %v2336_v42, %v1914_v55  ;;  %v2289_v41 = vpop.f32.mrf.mxu0  ;;  %v2428_v42 = vpop.permute.xlu1 %2427 }
 0x2cd   : > { %v2408_v10 = vmul.f32 %v3981_v9, %v2380_v54  ;;  %v2381_v49 = vadd.f32 %v4006_v6, %v2359_v5  ;;  %v2435_v21 = vadd.f32 %v2418_v1, %v2407_v36  ;;  %v2360_v22 = vadd.f32 %v2289_v41, %v1917_v33  ;;  %v2338_v61 = vpop.f32.mrf.mxu1 }
 0x2ce   : > { %v2463_v3 = vadd.f32 %v3994_v47, %v2357_v39  ;;  %v2358_v14 = vadd.f32 %v2338_v61, %v1915_v52  ;;  %v2293_v59 = vpop.f32.mrf.mxu0 }
 0x2cf   : > { %v2409_v53 = vmul.f32 %v4096_v8, %v2381_v49  ;;  %v2436_v29 = vadd.f32 %v2418_v1, %v2408_v10  ;;  %v2443_v43 = vmax.f32 %v2435_v21, 0.0  ;;  %v2382_v7 = vadd.f32 %v2718_v40, %v2360_v22  ;;  %v2340_v44 = vpop.f32.mrf.mxu1 }
 0x2d0   : > { %v2471_v32 = vmul.f32 %v2463_v3, %v3981_v9  ;;  %v2464_v60 = vadd.f32 %v4010_v38, %v2358_v14  ;;  %v2363_v19 = vadd.f32 %v2293_v59, %v1920_v25  ;;  %v2361_v17 = vadd.f32 %v2340_v44, %v1918_v15  ;;  %v2295_v45 = vpop.f32.mrf.mxu0 }
 0x2d1   : > { %v2444_v56 = vmax.f32 %v2436_v29, 0.0  ;;  %2451 = vst [vmem:[%s4020_s25] sm:$0xff] %v2443_v43  ;;  %v2410_v20 = vmul.f32 %v4096_v8, %v2382_v7  ;;  %v2437_v35 = vadd.f32 %v2423_v23, %v2409_v53  ;;  %v2364_v24 = vadd.f32 %v2295_v45, %v1921_v31  ;;  %v2342_v46 = vpop.f32.mrf.mxu1 }
 0x2d2   : > { %v2479_v48 = vadd.f32 %v2471_v32, %v2418_v1  ;;  %v2472_v11 = vmul.f32 %v2464_v60, %v3981_v9  ;;  %v2383_v55 = vadd.f32 %v2715_v37, %v2363_v19  ;;  %v2465_v2 = vadd.f32 %v4025_v12, %v2361_v17  ;;  %v2297_v52 = vpop.f32.mrf.mxu0 }
 0x2d3   : > { %2452 = vst [vmem:[%s4020_s25 + $0x8] sm:$0xff] %v2444_v56  ;;  %v2438_v33 = vadd.f32 %v2423_v23, %v2410_v20  ;;  %v2445_v13 = vmax.f32 %v2437_v35, 0.0  ;;  %v2384_v34 = vadd.f32 %v2716_v28, %v2364_v24  ;;  %v2362_v26 = vadd.f32 %v2342_v46, %v1919_v18  ;;  %v2346_v15 = vpop.f32.mrf.mxu1 }
 0x2d4   : > { %v2487_v25 = vmax.f32 %v2479_v48, 0.0  ;;  %v2480_v4 = vadd.f32 %v2472_v11, %v2418_v1  ;;  %v2411_v31 = vmul.f32 %v3984_v0, %v2383_v55  ;;  %v2473_v9 = vmul.f32 %v2465_v2, %v4096_v8  ;;  %v2299_v37 = vpop.f32.mrf.mxu0 }
 0x2d5   : > { %v2446_v36 = vmax.f32 %v2438_v33, 0.0  ;;  %2453 = vst [vmem:[%s4020_s25 + $0x10] sm:$0xff] %v2445_v13  ;;  %v2412_v54 = vmul.f32 %v3984_v0, %v2384_v34  ;;  %v2466_v5 = vadd.f32 %v2649_v30, %v2362_v26  ;;  %v2367_v51 = vadd.f32 %v2297_v52, %v3989_v27  ;;  %v2348_v28 = vpop.f32.mrf.mxu1 }
 0x2d6   : > { %2650 = vst [vmem:[%s4020_s25 + $0x40] sm:$0xff] %v2487_v25  ;;  %v2488_v18 = vmax.f32 %v2480_v4, 0.0  ;;  %v2481_v39 = vadd.f32 %v2473_v9, %v2423_v23  ;;  %v2439_v1 = vadd.f32 %v2428_v42, %v2411_v31  ;;  %v2365_v41 = vadd.f32 %v2346_v15, %v3998_v57 }
 0x2d7   : > { %2454 = vst [vmem:[%s4020_s25 + $0x18] sm:$0xff] %v2446_v36  ;;  %v2474_v10 = vmul.f32 %v2466_v5, %v4096_v8  ;;  %v2440_v49 = vadd.f32 %v2428_v42, %v2412_v54  ;;  %v2385_v21 = vadd.f32 %v4006_v6, %v2367_v51  ;;  %v2368_v22 = vadd.f32 %v2299_v37, %v4002_v63  ;;  %v2350_v61 = vpop.f32.mrf.mxu1  ;;  %v2433_v6 = vpop.permute.xlu0 %2432 }
 0x2d8   : > { %2651 = vst [vmem:[%s4020_s25 + $0x48] sm:$0xff] %v2488_v18  ;;  %v2489_v27 = vmax.f32 %v2481_v39, 0.0  ;;  %v2447_v3 = vmax.f32 %v2439_v1, 0.0  ;;  %v2467_v14 = vadd.f32 %v3994_v47, %v2365_v41  ;;  %v2366_v59 = vadd.f32 %v2348_v28, %v4000_v58 }
 0x2d9   : > { %v2482_v57 = vadd.f32 %v2474_v10, %v2423_v23  ;;  %v2448_v53 = vmax.f32 %v2440_v49, 0.0  ;;  %v2413_v29 = vmul.f32 %v3987_v50, %v2385_v21  ;;  %v2386_v8 = vadd.f32 %v2718_v40, %v2368_v22  ;;  %v2352_v43 = vpop.f32.mrf.mxu1 }
 0x2da   : > { %2652 = vst [vmem:[%s4020_s25 + $0x50] sm:$0xff] %v2489_v27  ;;  %2455 = vst [vmem:[%s4020_s25 + $0x20] sm:$0xff] %v2447_v3  ;;  %v2475_v63 = vmul.f32 %v2467_v14, %v3984_v0  ;;  %v2468_v7 = vadd.f32 %v4010_v38, %v2366_v59  ;;  %v2369_v44 = vadd.f32 %v2350_v61, %v4012_v62 }
 0x2db   : > { %v2370_v47 = vadd.f32 %v2352_v43, %v4014_v16  ;;  %v2490_v58 = vmax.f32 %v2482_v57, 0.0  ;;  %2456 = vst [vmem:[%s4020_s25 + $0x28] sm:$0xff] %v2448_v53  ;;  %v2441_v32 = vadd.f32 %v2433_v6, %v2413_v29  ;;  %v2414_v40 = vmul.f32 %v3987_v50, %v2386_v8 }
 0x2dc   : > { %v2483_v60 = vadd.f32 %v2475_v63, %v2428_v42  ;;  %v2476_v23 = vmul.f32 %v2468_v7, %v3984_v0  ;;  %v2469_v19 = vadd.f32 %v4025_v12, %v2369_v44 }
 0x2dd   : > { %v2470_v17 = vadd.f32 %v2649_v30, %v2370_v47  ;;  %2653 = vst [vmem:[%s4020_s25 + $0x58] sm:$0xff] %v2490_v58  ;;  %v2449_v38 = vmax.f32 %v2441_v32, 0.0  ;;  %v2442_v62 = vadd.f32 %v2433_v6, %v2414_v40 }
 0x2de   : > { %v2491_v16 = vmax.f32 %v2483_v60, 0.0  ;;  %v2484_v45 = vadd.f32 %v2476_v23, %v2428_v42  ;;  %v2477_v56 = vmul.f32 %v2469_v19, %v3987_v50 }
 0x2df   : > { %v2478_v20 = vmul.f32 %v2470_v17, %v3987_v50  ;;  %2457 = vst [vmem:[%s4020_s25 + $0x30] sm:$0xff] %v2449_v38  ;;  %v2450_v35 = vmax.f32 %v2442_v62, 0.0 }
 0x2e0   : > { %2654 = vst [vmem:[%s4020_s25 + $0x60] sm:$0xff] %v2491_v16  ;;  %v2492_v0 = vmax.f32 %v2484_v45, 0.0  ;;  %v2485_v24 = vadd.f32 %v2477_v56, %v2433_v6 }
 0x2e1   : > { %v2486_v46 = vadd.f32 %v2478_v20, %v2433_v6  ;;  %2458 = vst [vmem:[%s4020_s25 + $0x38] sm:$0xff] %v2450_v35 }
 0x2e2   : > { %2655 = vst [vmem:[%s4020_s25 + $0x68] sm:$0xff] %v2492_v0  ;;  %v2493_v12 = vmax.f32 %v2485_v24, 0.0 }
 0x2e3   : > { %v2494_v48 = vmax.f32 %v2486_v46, 0.0 }
 0x2e4   : > { %2656 = vst [vmem:[%s4020_s25 + $0x70] sm:$0xff] %v2493_v12 }
 0x2e5   : > { %2657 = vst [vmem:[%s4020_s25 + $0x78] sm:$0xff] %v2494_v48 }
 0x2e6 PF: > { %s15_s18 = sadd.s32 1, %s2725_s18  }
 0x2e7   : > { %p12_p4 = scmp.ge.s32.totalorder %s15_s18, 4  }
 0x2e9   :  { %14 = sbr.rel (!%p12_p4) target bundleno = 1 (0x1), region = 99 }

</bundles_post_ra>
